<compile_context>
chip_gen: v5e
topology: v5e:2x2
jax: 0.10.0
libtpu: 0.0.40
codegen_flags: <defaults>
</compile_context>

<pallas_src>
import functools

import jax
import jax.numpy as jnp
from jax.experimental import pallas as pl
from jax.experimental.pallas import tpu as pltpu

N_FEATURE = 40 * 1727   # 69080, hard-coded by the module's forward()
N_CLASS = 10
BATCH = 2
TK = 17280              # K tile: 135 * 128 lanes -> kp = 69120, 4 grid steps


def _linear_kernel(x_ref, w_ref, b_ref, o_ref, *, n_feature):
    """One grid step of the K reduction.

    x_ref: (B, tk) f32 tile of the flattened input (last tile is partial).
    w_ref: (n_class, tk) f32 tile of the weight, natural layout, zero-padded K.
    b_ref: (1, n_class) f32 bias.
    o_ref: (B, n_class) f32 output block, resident across the K grid axis and
           used directly as the accumulator (initialized with the bias).
    """
    k = pl.program_id(0)

    # Fused bias: the resident accumulator starts at the bias on step 0.
    @pl.when(k == 0)
    def _():
        o_ref[...] = jnp.broadcast_to(b_ref[...], o_ref.shape)

    x = x_ref[...]
    tk = x.shape[1]
    # The last K tile is a partial block (69080 % tk != 0): lanes past the
    # true feature count hold undefined VMEM data.  Zero them so garbage
    # (possibly NaN/Inf) never reaches the MXU.  Cheap VPU work, hidden under
    # the DMA / MXU of the step.  (Weight pad columns are zero as well.)
    col = k * tk + jax.lax.broadcasted_iota(jnp.int32, x.shape, 1)
    x = jnp.where(col < n_feature, x, 0.0)

    # out[b, n] += sum_k x[b, k] * w[n, k]   (x @ w.T on the MXU, NT pattern --
    # same contraction layout as flash-attention's q @ k^T, lowered with a
    # transposed-RHS MXU matmul, no materialized transpose.)
    o_ref[...] += jax.lax.dot_general(
        x, w_ref[...],
        dimension_numbers=(((1,), (1,)), ((), ())),
        preferred_element_type=jnp.float32,
    )


def prepare_params(weight, bias, *, tk=TK):
    """One-time layout prep (outside the hot path):
    - zero-pad the weight's K to a multiple of the K tile (natural (N, K)
      row-major layout is kept),
    - reshape the bias to (1, n_class) so it can be fed as a VMEM block."""
    n_class, n_feature = weight.shape
    kp = pl.cdiv(n_feature, tk) * tk
    w_padded = jnp.pad(weight.astype(jnp.float32),
                       ((0, 0), (0, kp - n_feature)))
    bias2d = bias.astype(jnp.float32).reshape(1, n_class)
    return w_padded, bias2d


@functools.partial(jax.jit, static_argnames=("tk",))
def svm2_forward(x, w_padded, bias2d, *, tk=TK):
    """x: (B, 40, 1727) f32; w_padded/bias2d: from prepare_params."""
    n_class, kp = w_padded.shape

    # Glue: flatten exactly like x.view(-1, 40*1727).  Contiguous reshape ->
    # pure metadata, no extra HBM traffic.  NO padding of x in the hot path.
    x2d = x.reshape(-1, N_FEATURE)
    if x2d.dtype != jnp.float32:
        x2d = x2d.astype(jnp.float32)
    b_dim = x2d.shape[0]

    out = pl.pallas_call(
        functools.partial(_linear_kernel, n_feature=N_FEATURE),
        out_shape=jax.ShapeDtypeStruct((b_dim, n_class), jnp.float32),
        grid_spec=pltpu.PrefetchScalarGridSpec(
            num_scalar_prefetch=0,
            grid=(kp // tk,),
            in_specs=[
                # (B, tk): second-to-last dim equals the full array dim, last
                # dim is a multiple of 128 -> legal; last block is partial and
                # masked in-kernel.
                pl.BlockSpec((b_dim, tk), lambda k: (0, k)),
                # (n_class, tk): natural weight layout, K tiled on lanes.
                pl.BlockSpec((n_class, tk), lambda k: (0, k)),
                # Bias, resident tiny block.
                pl.BlockSpec((1, n_class), lambda k: (0, 0)),
            ],
            out_specs=pl.BlockSpec((b_dim, n_class), lambda k: (0, 0)),
        ),
        compiler_params=pltpu.CompilerParams(
            dimension_semantics=("arbitrary",),
        ),
    )(x2d, w_padded, bias2d)

    return out


def init_params(key, n_feature=N_FEATURE, n_class=N_CLASS):
    """Deterministic init matching the module:
    kaiming_uniform_ (a=0, fan_in) on fc.weight, constant 0.1 on fc.bias."""
    bound = jnp.sqrt(6.0 / n_feature)  # gain*sqrt(3/fan_in), gain=sqrt(2)
    weight = jax.random.uniform(
        key, (n_class, n_feature), jnp.float32, minval=-bound, maxval=bound
    )
    bias = jnp.full((n_class,), 0.1, jnp.float32)
    return weight, bias


if __name__ == "__main__":
    key = jax.random.PRNGKey(0)
    k_w, k_x = jax.random.split(key)

    weight, bias = init_params(k_w)
    # One-time parameter layout prep, outside the per-call hot path.
    w_padded, bias2d = prepare_params(weight, bias)
    w_padded, bias2d = jax.block_until_ready((w_padded, bias2d))

    # Input consistent with forward(): flattenable to (-1, 40*1727).
    x = jax.random.normal(k_x, (BATCH, 40, 1727), jnp.float32)

    out = svm2_forward(x, w_padded, bias2d)
    out = jax.block_until_ready(out)

    # Sanity check against plain-JAX reference.
    ref = x.reshape(-1, N_FEATURE) @ weight.T + bias
    assert out.shape == (BATCH, N_CLASS)
    assert jnp.allclose(out, ref, atol=1e-3, rtol=1e-3)

    print("KERNEL_OK")
</pallas_src>

<mosaic_0001>
module attributes {stable_mosaic.version = 11 : i64} {
  func.func @_linear_kernel(%arg0: i32, %arg1: memref<2x17280xf32, #tpu.memory_space<vmem>>, %arg2: memref<10x17280xf32, #tpu.memory_space<vmem>>, %arg3: memref<1x10xf32, #tpu.memory_space<vmem>>, %arg4: memref<2x10xf32, #tpu.memory_space<vmem>>) attributes {dimension_semantics = [#tpu.dimension_semantics<arbitrary>], iteration_bounds = array<i64: 4>, scalar_prefetch = 0 : i64, scratch_operands = 0 : i64, tpu.core_type = #tpu.core_type<tc>, window_params = [{transform_indices = @transform_0, window_bounds = array<i64: 2, 17280>}, {transform_indices = @transform_1, window_bounds = array<i64: 10, 17280>}, {pipeline_mode = #tpu.pipeline_mode<synchronous>, transform_indices = @transform_2, window_bounds = array<i64: 1, 10>}, {pipeline_mode = #tpu.pipeline_mode<synchronous>, transform_indices = @transform_3, window_bounds = array<i64: 2, 10>}]} {
    %c0_i32 = arith.constant 0 : i32
    %0 = arith.cmpi eq, %arg0, %c0_i32 : i32
    %1 = arith.extui %0 : i1 to i32
    %c0_i32_0 = arith.constant 0 : i32
    %2 = arith.cmpi ne, %1, %c0_i32_0 : i32
    scf.if %2 {
      %c0_9 = arith.constant 0 : index
      %c0_10 = arith.constant 0 : index
      %17 = vector.load %arg3[%c0_9, %c0_10] : memref<1x10xf32, #tpu.memory_space<vmem>>, vector<1x10xf32>
      %18 = vector.shape_cast %17 : vector<1x10xf32> to vector<1x10xf32>
      %19 = vector.broadcast %18 : vector<1x10xf32> to vector<2x10xf32>
      %c0_11 = arith.constant 0 : index
      %c0_12 = arith.constant 0 : index
      %20 = vector.load %arg4[%c0_11, %c0_12] : memref<2x10xf32, #tpu.memory_space<vmem>>, vector<2x10xf32>
      tpu.vector_store %arg4[%c0_11, %c0_12], %19 {strides = array<i32>} : memref<2x10xf32, #tpu.memory_space<vmem>>, vector<2x10xf32>,
    } else {
    }
    %c0 = arith.constant 0 : index
    %c0_1 = arith.constant 0 : index
    %3 = vector.load %arg1[%c0, %c0_1] : memref<2x17280xf32, #tpu.memory_space<vmem>>, vector<2x17280xf32>
    %c17280_i32 = arith.constant 17280 : i32
    %4 = arith.muli %arg0, %c17280_i32 : i32
    %5 = tpu.iota {dimensions = array<i32: 1>} : vector<2x17280xi32>
    %6 = vector.broadcast %4 : i32 to vector<2x17280xi32>
    %7 = arith.addi %6, %5 : vector<2x17280xi32>
    %c69080_i32 = arith.constant 69080 : i32
    %8 = vector.broadcast %c69080_i32 : i32 to vector<2x17280xi32>
    %9 = arith.cmpi slt, %7, %8 : vector<2x17280xi32>
    %cst = arith.constant 0.000000e+00 : f32
    %10 = vector.broadcast %cst : f32 to vector<2x17280xf32>
    %11 = arith.select %9, %3, %10 : vector<2x17280xi1>, vector<2x17280xf32>
    %c0_2 = arith.constant 0 : index
    %c0_3 = arith.constant 0 : index
    %12 = vector.load %arg4[%c0_2, %c0_3] : memref<2x10xf32, #tpu.memory_space<vmem>>, vector<2x10xf32>
    %c0_4 = arith.constant 0 : index
    %c0_5 = arith.constant 0 : index
    %13 = vector.load %arg2[%c0_4, %c0_5] : memref<10x17280xf32, #tpu.memory_space<vmem>>, vector<10x17280xf32>
    %cst_6 = arith.constant dense<0.000000e+00> : vector<2x10xf32>
    %14 = tpu.matmul %11, %13, %cst_6 {dimension_numbers = #tpu.dot_dimension_numbers<[1], [1], [0], [0], [0, 0, 1, 0], [], []>} : vector<2x17280xf32>, vector<10x17280xf32>, vector<2x10xf32> -> vector<2x10xf32>
    %15 = arith.addf %12, %14 : vector<2x10xf32>
    %c0_7 = arith.constant 0 : index
    %c0_8 = arith.constant 0 : index
    %16 = vector.load %arg4[%c0_7, %c0_8] : memref<2x10xf32, #tpu.memory_space<vmem>>, vector<2x10xf32>
    tpu.vector_store %arg4[%c0_7, %c0_8], %15 {strides = array<i32>} : memref<2x10xf32, #tpu.memory_space<vmem>>, vector<2x10xf32>,
    return
  }
  func.func @transform_0(%arg0: i32) -> (i32, i32) {
    %c0_i32 = arith.constant 0 : i32
    %c0_i32_0 = arith.constant 0 : i32
    return %c0_i32, %arg0 : i32, i32
  }
  func.func @transform_1(%arg0: i32) -> (i32, i32) {
    %c0_i32 = arith.constant 0 : i32
    %c0_i32_0 = arith.constant 0 : i32
    return %c0_i32, %arg0 : i32, i32
  }
  func.func @transform_2(%arg0: i32) -> (i32, i32) {
    %c0_i32 = arith.constant 0 : i32
    %c0_i32_0 = arith.constant 0 : i32
    %c0_i32_1 = arith.constant 0 : i32
    return %c0_i32, %c0_i32_0 : i32, i32
  }
  func.func @transform_3(%arg0: i32) -> (i32, i32) {
    %c0_i32 = arith.constant 0 : i32
    %c0_i32_0 = arith.constant 0 : i32
    %c0_i32_1 = arith.constant 0 : i32
    return %c0_i32, %c0_i32_0 : i32, i32
  }
}

</mosaic_0001>

<bundles_post_ra>
// kernel: svm2_forward.1
= control target key start
LH: loop header
LB: loop body
LE: loop exit
PB: predicated region body
PF: predicated region fallthrough
CT: control target
= control target key end

     0   :  { %8 = vsyncpa [#allocation3], 0  ;;  %s5665_s0 = inlined_call_operand.vmem [shape: f32[2,69080], index: 0, kind: input, shape index: {}]   ;;  %s5666_s1 = inlined_call_operand.hbm [shape: f32[10,69120], index: 1, kind: input, shape index: {}]   ;;  %s5667_s2 = inlined_call_operand.hbm [shape: f32[1,10], index: 2, kind: input, shape index: {}]   ;;  %s5668_s3 = inlined_call_operand.hbm [shape: f32[2,10], index: 3, kind: output, shape index: {}]  }
   0x1   :  { %10 = vsyncpa [#allocation3 + $0x1], 0 }
   0x2   :  { %11 = vsyncpa [#allocation6], 0 }
   0x3   :  { %12 = vsyncpa [#allocation4], 0  ;;  %s4567_s12 = smov 0   ;;  %s4569_s13 = smov 0  }
   0x4   :  { %s4571_s14 = smov 0   ;;  %s4573_s15 = smov 0  }
   0x5 LB: > { %s4586_s16 = sadd.s32 4294967295, %s4540_s15   ;;  %s4589_s17 = sadd.s32 1, %s4540_s15   ;;  %s4540_s15 = sphi %s4573_s15, %s5676_s15   ;;  %s4536_s14 = sphi %s4571_s14, %s5675_s14   ;;  %s4532_s13 = sphi %s4569_s13, %s5674_s13   ;;  %s4528_s12 = sphi %s4567_s12, %s5673_s12  }
   0x6   : > { %s48_s18 = ssub.s32 %s4540_s15, %s4589_s17  ;;  %s51_s19 = sadd.s32 1, %s4536_s14 }
   0x7   : > { %p49_p0 = scmp.eq.s32.totalorder %s48_s18, 0  ;;  %p58_p1 = scmp.ne.s32.totalorder %s4536_s14, %s4532_s13 }
   0x8   : > { %p59_p2 = scmp.eq.s32.totalorder %s4540_s15, 0  ;;  %p64_p3 = scmp.ne.s32.totalorder %s4532_s13, %s4528_s12 }
   0x9   : > { %s4599_s20 = scalar_select %p49_p0, %s4536_s14, %s51_s19  }
   0xa   : > { %p4601_p4 = por %p59_p2, %p58_p1  ;;  %p65_p5 = scmp.eq.s32.totalorder %s4586_s16, 0 }
   0xb   : > { %p4199_p6 = scmp.ge.s32.totalorder %s4540_s15, 1  ;;  %p117_p7 = scmp.lt.s32.totalorder %s4540_s15, 5 }
   0xc   : > { %p4610_p8 = por %p65_p5, %p64_p3  ;;  %p4200_p9 = scmp.ne.s32.totalorder %s4586_s16, 0 }
   0xd   : > { %p4615_p10 = pnand %p4199_p6, %p117_p7  ;;  %s129_s26 = sshll.u32 %s5667_s2, 4  ;;  %s130_s26 = int_to_ptr.hbm [resolvable:$true] %s129_s26 }
   0xe   : > { %s4542_s27 = smov [#allocation5]   ;;  %p4368_p13 = scmp.lt.s32.totalorder %s4540_s15, 4 }
   0xf   : > { %p4359_p11 = pneg %p4615_p10  ;;  %s131_s28 = sshll.u32 %s4542_s27, 4  ;;  %s132_s28 = int_to_ptr.vmem [resolvable:$true] %s131_s28 }
  0x10   : > { %s151_s29 = sand.u32 1, %s4536_s14   ;;  %s4346_s30 = smul.u32 1080, %s4540_s15 }
  0x11   : > { %p4360_p12 = pnand %p4359_p11, %p65_p5  ;;  %p4631_p0 = pnand %p4368_p13, %p4601_p4 }
  0x12   : > { %s4347_s5 = smul.u32 2160, %s151_s29  ;;  %s160_s8 = scalar_lea.hbm %s5666_s1, %s4346_s30 }
  0x13   : > { %4362 = dma.hbm_to_vmem [thread:$0]  (!%p4360_p12), %s130_s26, 16, %s132_s28, [#allocation6]  }
  0x14   : > { %s161_s9 = sshll.u32 %s160_s8, 4  ;;  %s155_s10 = scalar_lea.vmem [#allocation2], %s4347_s5  ;;  %s162_s9 = int_to_ptr.hbm [resolvable:$true] %s161_s9 }
  0x15   : > { %s163_s11 = sshll.u32 %s155_s10, 4  ;;  %s152_s12 = scalar_lea.sflag [#allocation3], %s151_s29  ;;  %s164_s11 = int_to_ptr.vmem [resolvable:$true] %s163_s11 }
  0x16   : > { %s4440_s18 = sshra.s32 %s162_s9, 4  ;;  %p4444_p2 = pneg %p4631_p0  ;;  %s4441_s18 = int_to_ptr.hbm [resolvable:$true] %s4440_s18 }
  0x17   : > { %s4442_s15 = scalar_lea.hbm %s4441_s18, 2160  ;;  %s4447_s24 = scalar_lea.hbm %s5666_s1, 8640 }
  0x18   : > { %p4443_p1 = scmp.ne.s32.totalorder %s4441_s18, %s4442_s15  ;;  %p4448_p6 = scmp.lt.s32.totalorder %s4441_s18, %s5666_s1 }
  0x19   : > { %p4449_p7 = scmp.lt.s32.totalorder %s4447_s24, %s4442_s15 }
  0x1a   : > { %p4445_p3 = pnand %p4444_p2, %p4443_p1 }
  0x1b   : > { %p4450_p11 = por %p4449_p7, %p4448_p6 }
  0x1c   : > { %p4446_p4 = pneg %p4445_p3 }
  0x1e   : > { %p4451_p12 = pnand %p4450_p11, %p4446_p4 }
  0x20   : > { %4454 = shalt.err (!%p4451_p12)
}
  0x21   : > { %s4543_s27 = smov 69120   ;;  %s4544_s28 = smov 17280  }
  0x22   : > { %s4545_s29 = smov 1080   ;;  %175 = sbr.rel (%p4615_p10) target bundleno = 467 (0x1d3), region = 32 }
  0x23   : > { %4366 = dma.hbm_to_vmem [thread:$0]  (!%p4631_p0), %s162_s9, 34560, %s164_s11, %s152_s12, %s4543_s27, %s4544_s28, %s4545_s29  }
  0x24   : > { %s177_s30 = sand.u32 (!%p4615_p10), 1, %s4532_s13  }
  0x25   : > { %s4348_s5 = smul.u32 (!%p4615_p10), 2160, %s177_s30  ;;  %s178_s6 = scalar_lea.sflag (!%p4615_p10), [#allocation3], %s177_s30 }
  0x27   : > { %s4651_s7 = scalar_lea.vmem [#allocation2], %s4348_s5 }
  0x28   : > { %4515 = dma.done.wait (%p4610_p8), %s178_s6, 34560  }
  0x29   : > { %4517 = vsyncadd (%p4610_p8), %s178_s6, 4294932736 }
  0x2a   : > { %4519 = dma.done.wait (%p65_p5), [#allocation6], 16  }
  0x2b   : > { %4521 = vsyncadd (%p65_p5), [#allocation6], 4294967280  ;;  %s210_s23 = smul.u32 135, %s4586_s16 }
  0x2d   : > { %p211_p10 = scmp.lt.s32.totalorder %s210_s23, 539  ;;  %220 = sbr.rel (%p4200_p9) target bundleno = 52 (0x34), region = 44 }
  0x2f   : > { %s5678_s23 = smov (!%p211_p10, %s210_s23), 539 }
  0x30   : > { %s4205_s4 = sshll.u32 %s5678_s23, 1 }
  0x31   : > { %s4665_s10 = scalar_lea.vmem %s5665_s0, %s4205_s4 }
  0x32   : > { %v4409_v0 = vld [vmem:[#allocation5] ss:$0 sm:$0xff]  ;;  %vm225_vm0 = vcmask 74752  }
  0x33   : > { %226 = vst.msk [vmem:[#allocation7] sm:$0x3] %vm225_vm0, %v4409_v0 }
  0x34 PF: > { %v1281_v1 = vld [vmem:[%s4651_s7 + $0x448] sm:$0x3]  ;;  %v1279_v2 = vld [vmem:[%s4651_s7 + $0x438] sm:$0x3]  ;;  %v1280_v3 = vld [vmem:[%s4651_s7 + $0x440] sm:$0x3]  ;;  %v262_v4 = vlaneseq }
  0x35   : > { %1468 = vmatpush.xpose.msra.mxu2 %v1281_v1  ;;  %1428 = vmatpush.xpose.msra.mxu0 %v1279_v2  ;;  %v1282_v5 = vld [vmem:[%s4651_s7 + $0x450] sm:$0x3]  ;;  %s261_s22 = smul.u32 17280, %s4586_s16  ;;  %v1144_v7 = vld [vmem:[%s4651_s7] sm:$0xff]  ;;  %v227_v8 = vld [vmem:[%s4665_s10] sm:$0xff]  ;;  %s4546_s11 = smov [#allocation7]  }
  0x36   : > { %1448 = vmatpush.xpose.msra.mxu1 %v1280_v3  ;;  %1488 = vmatpush.xpose.msra.mxu3 %v1282_v5  ;;  %v1146_v6 = vld [vmem:[%s4651_s7 + $0x10] sm:$0xff]  ;;  %v4677_v9 = vand.u32 127, %v262_v4  ;;  %v1145_v10 = vld [vmem:[%s4651_s7 + $0x8] sm:$0xff]  ;;  %v1147_v11 = vld [vmem:[%s4651_s7 + $0x18] sm:$0xff]  ;;  %703 = vst [vmem:[#allocation1] ss:$4 sm:$0xff] %v227_v8 }
  0x37   : > { %v4681_v12 = vstv %s261_s22  ;;  %v1285_v13 = vld [vmem:[%s4651_s7 + $0x468] sm:$0x3]  ;;  %v1283_v18 = vld [vmem:[%s4651_s7 + $0x458] sm:$0x3]  ;;  %v1286_v19 = vld [vmem:[%s4651_s7 + $0x470] sm:$0x3] }
  0x38   : > { %v265_v14 = vadd.s32 256, %v4677_v9  ;;  %v399_v15 = vadd.s32 %v4681_v12, %v4677_v9  ;;  %v264_v16 = vadd.s32 128, %v4677_v9  ;;  %v266_v17 = vadd.s32 384, %v4677_v9  ;;  %v1284_v20 = vld [vmem:[%s4651_s7 + $0x460] sm:$0x3]  ;;  %v1150_v29 = vld [vmem:[%s4651_s7 + $0x30] sm:$0xff] }
  0x39   : > { %1469 = vmatpush.xpose.msra.mxu2 %v1146_v6  ;;  %1429 = vmatpush.xpose.msra.mxu0 %v1144_v7  ;;  %v228_v24 = vld [vmem:[%s4665_s10 + $0x8] sm:$0xff]  ;;  %v269_v25 = vadd.s32 768, %v4677_v9  ;;  %v267_v26 = vadd.s32 512, %v4677_v9  ;;  %v270_v27 = vadd.s32 896, %v4677_v9  ;;  %v268_v28 = vadd.s32 640, %v4677_v9  ;;  %v1151_v31 = vld [vmem:[%s4651_s7 + $0x38] sm:$0xff] }
  0x3a   : > { %1449 = vmatpush.xpose.msra.mxu1 %v1145_v10  ;;  %1489 = vmatpush.xpose.msra.mxu3 %v1147_v11  ;;  %v401_v21 = vadd.s32 %v4681_v12, %v265_v14  ;;  %v400_v22 = vadd.s32 %v4681_v12, %v264_v16  ;;  %v402_v23 = vadd.s32 %v4681_v12, %v266_v17  ;;  %vm534_vm2 = vcmp.lt.s32.totalorder %v399_v15, 69080  ;;  %v1148_v30 = vld [vmem:[%s4651_s7 + $0x20] sm:$0xff]  ;;  %v1149_v32 = vld [vmem:[%s4651_s7 + $0x28] sm:$0xff]  ;;  %v1287_v42 = vld [vmem:[%s4651_s7 + $0x478] sm:$0x3]  ;;  %s4123_s12 = sshll.u32 %s4546_s11, 4  ;;  %s4124_s12 = int_to_ptr.vmem [resolvable:$true] %s4123_s12 }
  0x3b   : > { %705 = vst [vmem:[#allocation1 + $0x20] ss:$4 sm:$0xff] %v228_v24  ;;  %v405_v35 = vadd.s32 %v4681_v12, %v269_v25  ;;  %v403_v38 = vadd.s32 %v4681_v12, %v267_v26  ;;  %v406_v39 = vadd.s32 %v4681_v12, %v270_v27  ;;  %v404_v40 = vadd.s32 %v4681_v12, %v268_v28  ;;  %v1289_v41 = vld [vmem:[%s4651_s7 + $0x488] sm:$0x3]  ;;  %v1290_v44 = vld [vmem:[%s4651_s7 + $0x490] sm:$0x3] }
  0x3c   : > { %vm536_vm1 = vcmp.lt.s32.totalorder %v401_v21, 69080  ;;  %vm535_vm3 = vcmp.lt.s32.totalorder %v400_v22, 69080  ;;  %vm537_vm4 = vcmp.lt.s32.totalorder %v402_v23, 69080  ;;  %v229_v43 = vld [vmem:[%s4665_s10 + $0x10] sm:$0xff]  ;;  %v1288_v45 = vld [vmem:[%s4651_s7 + $0x480] sm:$0x3] }
  0x3d   : > { %1548 = vmatpush.xpose.msrb.mxu2 %v1285_v13  ;;  %1508 = vmatpush.xpose.msrb.mxu0 %v1283_v18  ;;  %v708_v33 = vld.sshfl [vmem:[#allocation1 + $0x10] sm:$0xff pattern:$0x73625140]  ;;  %v706_v34 = vld.sshfl [vmem:[#allocation1] sm:$0xff pattern:$0x73625140] }
  0x3e   : > { %1568 = vmatpush.xpose.msrb.mxu3 %v1286_v19  ;;  %1528 = vmatpush.xpose.msrb.mxu1 %v1284_v20  ;;  %v707_v36 = vld.sshfl [vmem:[#allocation1 + $0x8] sm:$0xff pattern:$0x73625140]  ;;  %v709_v37 = vld.sshfl [vmem:[#allocation1 + $0x18] sm:$0xff pattern:$0x73625140] }
  0x3f   : > { %4209 = vmatmul.msk.f32.vlgmr.msra.gmra.mxu2 %vm536_vm1, %v708_v33  ;;  %4207 = vmatmul.msk.f32.vlgmr.msra.gmra.mxu0 %vm534_vm2, %v706_v34  ;;  %714 = vst [vmem:[#allocation1] ss:$4 sm:$0xff] %v229_v43  ;;  %vm540_vm5 = vcmp.lt.s32.totalorder %v405_v35, 69080  ;;  %v273_v46 = vadd.s32 1280, %v4677_v9  ;;  %v271_v47 = vadd.s32 1024, %v4677_v9  ;;  %v274_v48 = vadd.s32 1408, %v4677_v9 }
  0x40   : > { %4208 = vmatmul.msk.f32.vlgmr.msra.gmra.mxu1 %vm535_vm3, %v707_v36  ;;  %4210 = vmatmul.msk.f32.vlgmr.msra.gmra.mxu3 %vm537_vm4, %v709_v37  ;;  %vm538_vm6 = vcmp.lt.s32.totalorder %v403_v38, 69080  ;;  %vm541_vm7 = vcmp.lt.s32.totalorder %v406_v39, 69080  ;;  %vm539_vm8 = vcmp.lt.s32.totalorder %v404_v40, 69080  ;;  %v272_v49 = vadd.s32 1152, %v4677_v9  ;;  %v1154_v54 = vld [vmem:[%s4651_s7 + $0x50] sm:$0xff]  ;;  %v1152_v55 = vld [vmem:[%s4651_s7 + $0x40] sm:$0xff] }
  0x41   : > { %1549 = vmatpush.xpose.msrb.mxu2 %v1150_v29  ;;  %1509 = vmatpush.xpose.msrb.mxu0 %v1148_v30  ;;  %v409_v56 = vadd.s32 %v4681_v12, %v273_v46  ;;  %v407_v57 = vadd.s32 %v4681_v12, %v271_v47  ;;  %v410_v58 = vadd.s32 %v4681_v12, %v274_v48  ;;  %v230_v59 = vld [vmem:[%s4665_s10 + $0x18] sm:$0xff]  ;;  %v1155_v60 = vld [vmem:[%s4651_s7 + $0x58] sm:$0xff]  ;;  %v1153_v61 = vld [vmem:[%s4651_s7 + $0x48] sm:$0xff]  ;;  %v277_v7 = vadd.s32 1792, %v4677_v9  ;;  %s4125_s19 = sshll.u32 %s5668_s3, 4  ;;  %p4370_p5 = scmp.eq.s32.totalorder %s4586_s16, 3  ;;  %s4126_s19 = int_to_ptr.hbm [resolvable:$true] %s4125_s19 }
  0x42   : > { %1569 = vmatpush.xpose.msrb.mxu3 %v1151_v31  ;;  %1529 = vmatpush.xpose.msrb.mxu1 %v1149_v32  ;;  %v712_v50 = vld.sshfl [vmem:[#allocation1 + $0x30] sm:$0xff pattern:$0x73625140]  ;;  %v710_v51 = vld.sshfl [vmem:[#allocation1 + $0x20] sm:$0xff pattern:$0x73625140]  ;;  %v408_v1 = vadd.s32 %v4681_v12, %v272_v49 }
  0x43   : > { %v713_v52 = vld.sshfl [vmem:[#allocation1 + $0x38] sm:$0xff pattern:$0x73625140]  ;;  %v711_v53 = vld.sshfl [vmem:[#allocation1 + $0x28] sm:$0xff pattern:$0x73625140]  ;;  %v413_v21 = vadd.s32 %v4681_v12, %v277_v7 }
  0x44   : > { %715 = vst [vmem:[#allocation1 + $0x20] ss:$4 sm:$0xff] %v230_v59  ;;  %v1293_v62 = vld [vmem:[%s4651_s7 + $0x4a8] sm:$0x3]  ;;  %v1291_v63 = vld [vmem:[%s4651_s7 + $0x498] sm:$0x3] }
  0x45   : > { %1628 = vmatpush.xpose.msra.mxu2 %v1289_v41  ;;  %1588 = vmatpush.xpose.msra.mxu0 %v1287_v42  ;;  %v1294_v0 = vld [vmem:[%s4651_s7 + $0x4b0] sm:$0x3]  ;;  %v1292_v2 = vld [vmem:[%s4651_s7 + $0x4a0] sm:$0x3]  ;;  %vm544_vm9 = vcmp.lt.s32.totalorder %v409_v56, 69080  ;;  %vm542_vm10 = vcmp.lt.s32.totalorder %v407_v57, 69080 }
  0x46   : > { %1648 = vmatpush.xpose.msra.mxu3 %v1290_v44  ;;  %1608 = vmatpush.xpose.msra.mxu1 %v1288_v45  ;;  %v718_v3 = vld.sshfl [vmem:[#allocation1 + $0x10] sm:$0xff pattern:$0x73625140]  ;;  %vm545_vm11 = vcmp.lt.s32.totalorder %v410_v58, 69080  ;;  %v275_v8 = vadd.s32 1536, %v4677_v9  ;;  %v231_v10 = vld [vmem:[%s4665_s10 + $0x20] sm:$0xff] }
  0x47   : > { %4213 = vmatmul.msk.f32.vlgmr.msrb.gmra.mxu2 %vm540_vm5, %v712_v50  ;;  %4211 = vmatmul.msk.f32.vlgmr.msrb.gmra.mxu0 %vm538_vm6, %v710_v51  ;;  %v716_v4 = vld.sshfl [vmem:[#allocation1] sm:$0xff pattern:$0x73625140]  ;;  %v719_v5 = vld.sshfl [vmem:[#allocation1 + $0x18] sm:$0xff pattern:$0x73625140] }
  0x48   : > { %4214 = vmatmul.msk.f32.vlgmr.msrb.gmra.mxu3 %vm541_vm7, %v713_v52  ;;  %4212 = vmatmul.msk.f32.vlgmr.msrb.gmra.mxu1 %vm539_vm8, %v711_v53  ;;  %v717_v6 = vld.sshfl [vmem:[#allocation1 + $0x8] sm:$0xff pattern:$0x73625140]  ;;  %vm543_vm12 = vcmp.lt.s32.totalorder %v408_v1, 69080  ;;  %v278_v13 = vadd.s32 1920, %v4677_v9  ;;  %v276_v14 = vadd.s32 1664, %v4677_v9  ;;  %v411_v23 = vadd.s32 %v4681_v12, %v275_v8 }
  0x49   : > { %1629 = vmatpush.xpose.msra.mxu2 %v1154_v54  ;;  %1589 = vmatpush.xpose.msra.mxu0 %v1152_v55  ;;  %v1158_v11 = vld [vmem:[%s4651_s7 + $0x70] sm:$0xff]  ;;  %724 = vst [vmem:[#allocation1] ss:$4 sm:$0xff] %v231_v10  ;;  %v1156_v15 = vld [vmem:[%s4651_s7 + $0x60] sm:$0xff]  ;;  %v1159_v16 = vld [vmem:[%s4651_s7 + $0x78] sm:$0xff]  ;;  %v281_v30 = vadd.s32 2304, %v4677_v9 }
  0x4a   : > { %1649 = vmatpush.xpose.msra.mxu3 %v1155_v60  ;;  %1609 = vmatpush.xpose.msra.mxu1 %v1153_v61  ;;  %v1157_v17 = vld [vmem:[%s4651_s7 + $0x68] sm:$0xff]  ;;  %v1295_v19 = vld [vmem:[%s4651_s7 + $0x4b8] sm:$0x3]  ;;  %v1298_v20 = vld [vmem:[%s4651_s7 + $0x4d0] sm:$0x3]  ;;  %v414_v26 = vadd.s32 %v4681_v12, %v278_v13  ;;  %v412_v28 = vadd.s32 %v4681_v12, %v276_v14  ;;  %v279_v32 = vadd.s32 2048, %v4677_v9 }
  0x4b   : > { %v1297_v18 = vld [vmem:[%s4651_s7 + $0x4c8] sm:$0x3]  ;;  %v1296_v24 = vld [vmem:[%s4651_s7 + $0x4c0] sm:$0x3]  ;;  %v282_v33 = vadd.s32 2432, %v4677_v9  ;;  %v280_v34 = vadd.s32 2176, %v4677_v9  ;;  %v417_v39 = vadd.s32 %v4681_v12, %v281_v30 }
  0x4c   : > { %v722_v22 = vld.sshfl [vmem:[#allocation1 + $0x30] sm:$0xff pattern:$0x73625140]  ;;  %v720_v25 = vld.sshfl [vmem:[#allocation1 + $0x20] sm:$0xff pattern:$0x73625140]  ;;  %v415_v43 = vadd.s32 %v4681_v12, %v279_v32 }
  0x4d   : > { %1708 = vmatpush.xpose.msrb.mxu2 %v1293_v62  ;;  %1668 = vmatpush.xpose.msrb.mxu0 %v1291_v63  ;;  %v723_v27 = vld.sshfl [vmem:[#allocation1 + $0x38] sm:$0xff pattern:$0x73625140]  ;;  %v721_v29 = vld.sshfl [vmem:[#allocation1 + $0x28] sm:$0xff pattern:$0x73625140]  ;;  %v418_v45 = vadd.s32 %v4681_v12, %v282_v33  ;;  %v416_v47 = vadd.s32 %v4681_v12, %v280_v34 }
  0x4e   : > { %1728 = vmatpush.xpose.msrb.mxu3 %v1294_v0  ;;  %1688 = vmatpush.xpose.msrb.mxu1 %v1292_v2  ;;  %v232_v31 = vld [vmem:[%s4665_s10 + $0x28] sm:$0xff]  ;;  %vm548_vm13 = vcmp.lt.s32.totalorder %v413_v21, 69080  ;;  %vm546_vm14 = vcmp.lt.s32.totalorder %v411_v23, 69080  ;;  %vm549_vm15 = vcmp.lt.s32.totalorder %v414_v26, 69080  ;;  %vm547_vm0 = vcmp.lt.s32.totalorder %v412_v28, 69080  ;;  %v1163_v37 = vld [vmem:[%s4651_s7 + $0x98] sm:$0xff] }
  0x4f   : > { %4217 = vmatmul.msk.f32.vlgmr.msra.gmra.mxu2 %vm544_vm9, %v718_v3  ;;  %4215 = vmatmul.msk.f32.vlgmr.msra.gmra.mxu0 %vm542_vm10, %v716_v4  ;;  %725 = vst [vmem:[#allocation1 + $0x20] ss:$4 sm:$0xff] %v232_v31  ;;  %v1162_v35 = vld [vmem:[%s4651_s7 + $0x90] sm:$0xff]  ;;  %v1160_v36 = vld [vmem:[%s4651_s7 + $0x80] sm:$0xff]  ;;  %v1161_v38 = vld [vmem:[%s4651_s7 + $0x88] sm:$0xff]  ;;  %v285_v42 = vadd.s32 2816, %v4677_v9 }
  0x50   : > { %4218 = vmatmul.msk.f32.vlgmr.msra.gmra.mxu3 %vm545_vm11, %v719_v5  ;;  %4216 = vmatmul.msk.f32.vlgmr.msra.gmra.mxu1 %vm543_vm12, %v717_v6  ;;  %v728_v40 = vld.sshfl [vmem:[#allocation1 + $0x10] sm:$0xff pattern:$0x73625140]  ;;  %v726_v44 = vld.sshfl [vmem:[#allocation1] sm:$0xff pattern:$0x73625140] }
  0x51   : > { %1709 = vmatpush.xpose.msrb.mxu2 %v1158_v11  ;;  %1669 = vmatpush.xpose.msrb.mxu0 %v1156_v15  ;;  %v1301_v41 = vld [vmem:[%s4651_s7 + $0x4e8] sm:$0x3]  ;;  %v729_v46 = vld.sshfl [vmem:[#allocation1 + $0x18] sm:$0xff pattern:$0x73625140]  ;;  %v283_v53 = vadd.s32 2560, %v4677_v9  ;;  %v421_v58 = vadd.s32 %v4681_v12, %v285_v42 }
  0x52   : > { %1729 = vmatpush.xpose.msrb.mxu3 %v1159_v16  ;;  %1689 = vmatpush.xpose.msrb.mxu1 %v1157_v17  ;;  %v1299_v48 = vld [vmem:[%s4651_s7 + $0x4d8] sm:$0x3]  ;;  %v727_v49 = vld.sshfl [vmem:[#allocation1 + $0x8] sm:$0xff pattern:$0x73625140]  ;;  %vm552_vm1 = vcmp.lt.s32.totalorder %v417_v39, 69080 }
  0x53   : > { %v233_v50 = vld [vmem:[%s4665_s10 + $0x30] sm:$0xff]  ;;  %v1302_v51 = vld [vmem:[%s4651_s7 + $0x4f0] sm:$0x3]  ;;  %v1300_v52 = vld [vmem:[%s4651_s7 + $0x4e0] sm:$0x3]  ;;  %vm550_vm2 = vcmp.lt.s32.totalorder %v415_v43, 69080  ;;  %v419_v62 = vadd.s32 %v4681_v12, %v283_v53 }
  0x54   : > { %734 = vst [vmem:[#allocation1] ss:$4 sm:$0xff] %v233_v50  ;;  %vm553_vm3 = vcmp.lt.s32.totalorder %v418_v45, 69080  ;;  %vm551_vm4 = vcmp.lt.s32.totalorder %v416_v47, 69080  ;;  %v1166_v54 = vld [vmem:[%s4651_s7 + $0xb0] sm:$0xff]  ;;  %v286_v56 = vadd.s32 2944, %v4677_v9 }
  0x55   : > { %1788 = vmatpush.xpose.msra.mxu2 %v1297_v18  ;;  %1748 = vmatpush.xpose.msra.mxu0 %v1295_v19  ;;  %v284_v57 = vadd.s32 2688, %v4677_v9  ;;  %v1164_v61 = vld [vmem:[%s4651_s7 + $0xa0] sm:$0xff]  ;;  %v1167_v1 = vld [vmem:[%s4651_s7 + $0xb8] sm:$0xff]  ;;  %v1165_v2 = vld [vmem:[%s4651_s7 + $0xa8] sm:$0xff]  ;;  %vm556_vm5 = vcmp.lt.s32.totalorder %v421_v58, 69080  ;;  %vm554_vm6 = vcmp.lt.s32.totalorder %v419_v62, 69080 }
  0x56   : > { %1808 = vmatpush.xpose.msra.mxu3 %v1298_v20  ;;  %1768 = vmatpush.xpose.msra.mxu1 %v1296_v24  ;;  %v732_v55 = vld.sshfl [vmem:[#allocation1 + $0x30] sm:$0xff pattern:$0x73625140]  ;;  %v730_v59 = vld.sshfl [vmem:[#allocation1 + $0x20] sm:$0xff pattern:$0x73625140]  ;;  %v422_v5 = vadd.s32 %v4681_v12, %v286_v56 }
  0x57   : > { %4221 = vmatmul.msk.f32.vlgmr.msrb.gmra.mxu2 %vm548_vm13, %v722_v22  ;;  %4219 = vmatmul.msk.f32.vlgmr.msrb.gmra.mxu0 %vm546_vm14, %v720_v25  ;;  %v733_v60 = vld.sshfl [vmem:[#allocation1 + $0x38] sm:$0xff pattern:$0x73625140]  ;;  %v731_v63 = vld.sshfl [vmem:[#allocation1 + $0x28] sm:$0xff pattern:$0x73625140]  ;;  %v420_v7 = vadd.s32 %v4681_v12, %v284_v57 }
  0x58   : > { %4222 = vmatmul.msk.f32.vlgmr.msrb.gmra.mxu3 %vm549_vm15, %v723_v27  ;;  %4220 = vmatmul.msk.f32.vlgmr.msrb.gmra.mxu1 %vm547_vm0, %v721_v29  ;;  %v234_v0 = vld [vmem:[%s4665_s10 + $0x38] sm:$0xff]  ;;  %v1305_v3 = vld [vmem:[%s4651_s7 + $0x508] sm:$0x3]  ;;  %v1303_v4 = vld [vmem:[%s4651_s7 + $0x4f8] sm:$0x3]  ;;  %v289_v10 = vadd.s32 3328, %v4677_v9 }
  0x59   : > { %1789 = vmatpush.xpose.msra.mxu2 %v1162_v35  ;;  %1749 = vmatpush.xpose.msra.mxu0 %v1160_v36  ;;  %735 = vst [vmem:[#allocation1 + $0x20] ss:$4 sm:$0xff] %v234_v0  ;;  %v1306_v6 = vld [vmem:[%s4651_s7 + $0x510] sm:$0x3]  ;;  %v1304_v8 = vld [vmem:[%s4651_s7 + $0x500] sm:$0x3] }
  0x5a   : > { %1809 = vmatpush.xpose.msra.mxu3 %v1163_v37  ;;  %1769 = vmatpush.xpose.msra.mxu1 %v1161_v38  ;;  %v287_v13 = vadd.s32 3072, %v4677_v9  ;;  %v290_v16 = vadd.s32 3456, %v4677_v9  ;;  %v288_v17 = vadd.s32 3200, %v4677_v9  ;;  %v235_v19 = vld [vmem:[%s4665_s10 + $0x40] sm:$0xff]  ;;  %vm557_vm7 = vcmp.lt.s32.totalorder %v422_v5, 69080  ;;  %v1170_v20 = vld [vmem:[%s4651_s7 + $0xd0] sm:$0xff] }
  0x5b   : > { %v738_v11 = vld.sshfl [vmem:[#allocation1 + $0x10] sm:$0xff pattern:$0x73625140]  ;;  %v736_v14 = vld.sshfl [vmem:[#allocation1] sm:$0xff pattern:$0x73625140]  ;;  %v425_v24 = vadd.s32 %v4681_v12, %v289_v10 }
  0x5c   : > { %v739_v15 = vld.sshfl [vmem:[#allocation1 + $0x18] sm:$0xff pattern:$0x73625140]  ;;  %v737_v18 = vld.sshfl [vmem:[#allocation1 + $0x8] sm:$0xff pattern:$0x73625140]  ;;  %v423_v28 = vadd.s32 %v4681_v12, %v287_v13  ;;  %v426_v29 = vadd.s32 %v4681_v12, %v290_v16  ;;  %v424_v30 = vadd.s32 %v4681_v12, %v288_v17 }
  0x5d   : > { %1868 = vmatpush.xpose.msrb.mxu2 %v1301_v41  ;;  %1828 = vmatpush.xpose.msrb.mxu0 %v1299_v48  ;;  %vm555_vm8 = vcmp.lt.s32.totalorder %v420_v7, 69080  ;;  %744 = vst [vmem:[#allocation1] ss:$4 sm:$0xff] %v235_v19  ;;  %v1168_v21 = vld [vmem:[%s4651_s7 + $0xc0] sm:$0xff]  ;;  %v1171_v22 = vld [vmem:[%s4651_s7 + $0xd8] sm:$0xff]  ;;  %v1169_v23 = vld [vmem:[%s4651_s7 + $0xc8] sm:$0xff] }
  0x5e   : > { %1888 = vmatpush.xpose.msrb.mxu3 %v1302_v51  ;;  %1848 = vmatpush.xpose.msrb.mxu1 %v1300_v52  ;;  %v1309_v25 = vld [vmem:[%s4651_s7 + $0x528] sm:$0x3]  ;;  %v1307_v26 = vld [vmem:[%s4651_s7 + $0x518] sm:$0x3]  ;;  %v1310_v27 = vld [vmem:[%s4651_s7 + $0x530] sm:$0x3] }
  0x5f   : > { %4225 = vmatmul.msk.f32.vlgmr.msra.gmra.mxu2 %vm552_vm1, %v728_v40  ;;  %4223 = vmatmul.msk.f32.vlgmr.msra.gmra.mxu0 %vm550_vm2, %v726_v44  ;;  %v1308_v31 = vld [vmem:[%s4651_s7 + $0x520] sm:$0x3]  ;;  %v293_v35 = vadd.s32 3840, %v4677_v9  ;;  %v291_v36 = vadd.s32 3584, %v4677_v9  ;;  %v294_v39 = vadd.s32 3968, %v4677_v9  ;;  %vm560_vm9 = vcmp.lt.s32.totalorder %v425_v24, 69080 }
  0x60   : > { %4226 = vmatmul.msk.f32.vlgmr.msra.gmra.mxu3 %vm553_vm3, %v729_v46  ;;  %4224 = vmatmul.msk.f32.vlgmr.msra.gmra.mxu1 %vm551_vm4, %v727_v49  ;;  %v4814_v32 = vld.sshfl [vmem:[#allocation1 + $0x30] sm:$0xff pattern:$0x73625140]  ;;  %v4816_v33 = vld.sshfl [vmem:[#allocation1 + $0x20] sm:$0xff pattern:$0x73625140] }
  0x61   : > { %1869 = vmatpush.xpose.msrb.mxu2 %v1166_v54  ;;  %1829 = vmatpush.xpose.msrb.mxu0 %v1164_v61  ;;  %v4818_v34 = vld.sshfl [vmem:[#allocation1 + $0x38] sm:$0xff pattern:$0x73625140]  ;;  %v4822_v37 = vld.sshfl [vmem:[#allocation1 + $0x28] sm:$0xff pattern:$0x73625140]  ;;  %v429_v45 = vadd.s32 %v4681_v12, %v293_v35  ;;  %v427_v46 = vadd.s32 %v4681_v12, %v291_v36  ;;  %v430_v50 = vadd.s32 %v4681_v12, %v294_v39 }
  0x62   : > { %1889 = vmatpush.xpose.msrb.mxu3 %v1167_v1  ;;  %1849 = vmatpush.xpose.msrb.mxu1 %v1165_v2  ;;  %v236_v38 = vld [vmem:[%s4665_s10 + $0x48] sm:$0xff]  ;;  %vm558_vm10 = vcmp.lt.s32.totalorder %v423_v28, 69080  ;;  %vm561_vm11 = vcmp.lt.s32.totalorder %v426_v29, 69080  ;;  %vm559_vm12 = vcmp.lt.s32.totalorder %v424_v30, 69080  ;;  %v1175_v42 = vld [vmem:[%s4651_s7 + $0xf8] sm:$0xff]  ;;  %v292_v43 = vadd.s32 3712, %v4677_v9 }
  0x63   : > { %745 = vst [vmem:[#allocation1 + $0x20] ss:$4 sm:$0xff] %v236_v38  ;;  %v1174_v40 = vld [vmem:[%s4651_s7 + $0xf0] sm:$0xff]  ;;  %v1172_v41 = vld [vmem:[%s4651_s7 + $0xe0] sm:$0xff]  ;;  %v1173_v49 = vld [vmem:[%s4651_s7 + $0xe8] sm:$0xff]  ;;  %vm564_vm13 = vcmp.lt.s32.totalorder %v429_v45, 69080 }
  0x64   : > { %v4830_v44 = vld.sshfl [vmem:[#allocation1 + $0x10] sm:$0xff pattern:$0x73625140]  ;;  %v4834_v47 = vld.sshfl [vmem:[#allocation1] sm:$0xff pattern:$0x73625140]  ;;  %v428_v56 = vadd.s32 %v4681_v12, %v292_v43 }
  0x65   : > { %1948 = vmatpush.xpose.msra.mxu2 %v1305_v3  ;;  %1908 = vmatpush.xpose.msra.mxu0 %v1303_v4  ;;  %v4836_v48 = vld.sshfl [vmem:[#allocation1 + $0x18] sm:$0xff pattern:$0x73625140]  ;;  %v4840_v51 = vld.sshfl [vmem:[#allocation1 + $0x8] sm:$0xff pattern:$0x73625140] }
  0x66   : > { %1968 = vmatpush.xpose.msra.mxu3 %v1306_v6  ;;  %1928 = vmatpush.xpose.msra.mxu1 %v1304_v8  ;;  %v237_v52 = vld [vmem:[%s4665_s10 + $0x50] sm:$0xff]  ;;  %v1312_v57 = vld [vmem:[%s4651_s7 + $0x540] sm:$0x3]  ;;  %vm562_vm14 = vcmp.lt.s32.totalorder %v427_v46, 69080  ;;  %v297_v58 = vadd.s32 4352, %v4677_v9  ;;  %vm565_vm15 = vcmp.lt.s32.totalorder %v430_v50, 69080 }
  0x67   : > { %4229 = vmatmul.msk.f32.vlgmr.msrb.gmra.mxu2 %vm556_vm5, %v732_v55  ;;  %4227 = vmatmul.msk.f32.vlgmr.msrb.gmra.mxu0 %vm554_vm6, %v730_v59  ;;  %v1313_v53 = vld [vmem:[%s4651_s7 + $0x548] sm:$0x3]  ;;  %v1311_v54 = vld [vmem:[%s4651_s7 + $0x538] sm:$0x3]  ;;  %754 = vst [vmem:[#allocation1] ss:$4 sm:$0xff] %v237_v52 }
  0x68   : > { %4230 = vmatmul.msk.f32.vlgmr.msrb.gmra.mxu3 %vm557_vm7, %v733_v60  ;;  %4228 = vmatmul.msk.f32.vlgmr.msrb.gmra.mxu1 %vm555_vm8, %v731_v63  ;;  %v1314_v55 = vld [vmem:[%s4651_s7 + $0x550] sm:$0x3]  ;;  %v295_v59 = vadd.s32 4096, %v4677_v9  ;;  %v298_v60 = vadd.s32 4480, %v4677_v9  ;;  %vm563_vm0 = vcmp.lt.s32.totalorder %v428_v56, 69080  ;;  %v296_v0 = vadd.s32 4224, %v4677_v9 }
  0x69   : > { %1949 = vmatpush.xpose.msra.mxu2 %v1170_v20  ;;  %1909 = vmatpush.xpose.msra.mxu0 %v1168_v21  ;;  %v238_v2 = vld [vmem:[%s4665_s10 + $0x58] sm:$0xff]  ;;  %v1179_v5 = vld [vmem:[%s4651_s7 + $0x118] sm:$0xff]  ;;  %v1177_v6 = vld [vmem:[%s4651_s7 + $0x108] sm:$0xff]  ;;  %v433_v8 = vadd.s32 %v4681_v12, %v297_v58  ;;  %v302_v19 = vadd.s32 4992, %v4677_v9  ;;  %v300_v20 = vadd.s32 4736, %v4677_v9  ;;  %v305_v43 = vadd.s32 5376, %v4677_v9 }
  0x6a   : > { %1969 = vmatpush.xpose.msra.mxu3 %v1171_v22  ;;  %1929 = vmatpush.xpose.msra.mxu1 %v1169_v23  ;;  %v4853_v61 = vld.sshfl [vmem:[#allocation1 + $0x30] sm:$0xff pattern:$0x73625140]  ;;  %v4855_v62 = vld.sshfl [vmem:[#allocation1 + $0x20] sm:$0xff pattern:$0x73625140]  ;;  %v431_v10 = vadd.s32 %v4681_v12, %v295_v59  ;;  %v432_v16 = vadd.s32 %v4681_v12, %v296_v0 }
  0x6b   : > { %v4857_v63 = vld.sshfl [vmem:[#allocation1 + $0x38] sm:$0xff pattern:$0x73625140]  ;;  %v4860_v1 = vld.sshfl [vmem:[#allocation1 + $0x28] sm:$0xff pattern:$0x73625140]  ;;  %v436_v36 = vadd.s32 %v4681_v12, %v300_v20  ;;  %v441_v56 = vadd.s32 %v4681_v12, %v305_v43 }
  0x6c   : > { %v1178_v3 = vld [vmem:[%s4651_s7 + $0x110] sm:$0xff]  ;;  %v1176_v4 = vld [vmem:[%s4651_s7 + $0x100] sm:$0xff]  ;;  %755 = vst [vmem:[#allocation1 + $0x20] ss:$4 sm:$0xff] %v238_v2  ;;  %v1317_v7 = vld [vmem:[%s4651_s7 + $0x568] sm:$0x3] }
  0x6d   : > { %2028 = vmatpush.xpose.msrb.mxu2 %v1309_v25  ;;  %1988 = vmatpush.xpose.msrb.mxu0 %v1307_v26  ;;  %v1315_v13 = vld [vmem:[%s4651_s7 + $0x558] sm:$0x3]  ;;  %v1316_v17 = vld [vmem:[%s4651_s7 + $0x560] sm:$0x3]  ;;  %vm568_vm1 = vcmp.lt.s32.totalorder %v433_v8, 69080  ;;  %vm566_vm2 = vcmp.lt.s32.totalorder %v431_v10, 69080 }
  0x6e   : > { %2048 = vmatpush.xpose.msrb.mxu3 %v1310_v27  ;;  %2008 = vmatpush.xpose.msrb.mxu1 %v1308_v31  ;;  %v239_v21 = vld [vmem:[%s4665_s10 + $0x60] sm:$0xff]  ;;  %v4887_v22 = vld.sshfl [vmem:[#allocation1 + $0x10] sm:$0xff pattern:$0x73625140]  ;;  %vm567_vm4 = vcmp.lt.s32.totalorder %v432_v16, 69080  ;;  %v1182_v26 = vld [vmem:[%s4651_s7 + $0x130] sm:$0xff] }
  0x6f   : > { %4233 = vmatmul.msk.f32.vlgmr.msra.gmra.mxu2 %vm560_vm9, %v738_v11  ;;  %4231 = vmatmul.msk.f32.vlgmr.msra.gmra.mxu0 %vm558_vm10, %v736_v14  ;;  %v434_v11 = vadd.s32 %v4681_v12, %v298_v60  ;;  %v1318_v14 = vld [vmem:[%s4651_s7 + $0x570] sm:$0x3]  ;;  %v4889_v23 = vld.sshfl [vmem:[#allocation1] sm:$0xff pattern:$0x73625140]  ;;  %v1180_v27 = vld [vmem:[%s4651_s7 + $0x120] sm:$0xff] }
  0x70   : > { %4234 = vmatmul.msk.f32.vlgmr.msra.gmra.mxu3 %vm561_vm11, %v739_v15  ;;  %4232 = vmatmul.msk.f32.vlgmr.msra.gmra.mxu1 %vm559_vm12, %v737_v18  ;;  %v301_v15 = vadd.s32 4864, %v4677_v9  ;;  %v299_v18 = vadd.s32 4608, %v4677_v9  ;;  %v4891_v24 = vld.sshfl [vmem:[#allocation1 + $0x18] sm:$0xff pattern:$0x73625140]  ;;  %v1183_v28 = vld [vmem:[%s4651_s7 + $0x138] sm:$0xff] }
  0x71   : > { %2029 = vmatpush.xpose.msrb.mxu2 %v1174_v40  ;;  %1989 = vmatpush.xpose.msrb.mxu0 %v1172_v41  ;;  %v4893_v25 = vld.sshfl [vmem:[#allocation1 + $0x8] sm:$0xff pattern:$0x73625140]  ;;  %vm569_vm3 = vcmp.lt.s32.totalorder %v434_v11, 69080  ;;  %v1181_v29 = vld [vmem:[%s4651_s7 + $0x128] sm:$0xff]  ;;  %vm571_vm8 = vcmp.lt.s32.totalorder %v436_v36, 69080 }
  0x72   : > { %2049 = vmatpush.xpose.msrb.mxu3 %v1175_v42  ;;  %2009 = vmatpush.xpose.msrb.mxu1 %v1173_v49  ;;  %764 = vst [vmem:[#allocation1] ss:$4 sm:$0xff] %v239_v21  ;;  %v437_v30 = vadd.s32 %v4681_v12, %v301_v15  ;;  %v1321_v31 = vld [vmem:[%s4651_s7 + $0x588] sm:$0x3]  ;;  %v1319_v35 = vld [vmem:[%s4651_s7 + $0x578] sm:$0x3] }
  0x73   : > { %v240_v38 = vld [vmem:[%s4665_s10 + $0x68] sm:$0xff]  ;;  %v4916_v39 = vld.sshfl [vmem:[#allocation1 + $0x38] sm:$0xff pattern:$0x73625140]  ;;  %v303_v45 = vadd.s32 5120, %v4677_v9  ;;  %v306_v46 = vadd.s32 5504, %v4677_v9 }
  0x74   : > { %v4918_v40 = vld.sshfl [vmem:[#allocation1 + $0x28] sm:$0xff pattern:$0x73625140]  ;;  %vm572_vm5 = vcmp.lt.s32.totalorder %v437_v30, 69080  ;;  %v1323_v59 = vld [vmem:[%s4651_s7 + $0x598] sm:$0x3] }
  0x75   : > { %2108 = vmatpush.xpose.msra.mxu2 %v1313_v53  ;;  %2068 = vmatpush.xpose.msra.mxu0 %v1311_v54  ;;  %v1322_v41 = vld [vmem:[%s4651_s7 + $0x590] sm:$0x3]  ;;  %v1320_v42 = vld [vmem:[%s4651_s7 + $0x580] sm:$0x3]  ;;  %v241_v53 = vld [vmem:[%s4665_s10 + $0x70] sm:$0xff]  ;;  %v439_v58 = vadd.s32 %v4681_v12, %v303_v45  ;;  %v309_v60 = vadd.s32 5888, %v4677_v9 }
  0x76   : > { %2128 = vmatpush.xpose.msra.mxu3 %v1314_v55  ;;  %2088 = vmatpush.xpose.msra.mxu1 %v1312_v57  ;;  %v1187_v54 = vld [vmem:[%s4651_s7 + $0x158] sm:$0xff]  ;;  %v1185_v55 = vld [vmem:[%s4651_s7 + $0x148] sm:$0xff]  ;;  %v310_v2 = vadd.s32 6016, %v4677_v9  ;;  %vm576_vm9 = vcmp.lt.s32.totalorder %v441_v56, 69080  ;;  %v1330_v16 = vld [vmem:[%s4651_s7 + $0x5d0] sm:$0x3] }
  0x77   : > { %4237 = vmatmul.msk.f32.vlgmr.msrb.gmra.mxu2 %vm564_vm13, %v4814_v32  ;;  %4235 = vmatmul.msk.f32.vlgmr.msrb.gmra.mxu0 %vm562_vm14, %v4816_v33  ;;  %v4901_v32 = vld.sshfl [vmem:[#allocation1 + $0x30] sm:$0xff pattern:$0x73625140]  ;;  %v435_v33 = vadd.s32 %v4681_v12, %v299_v18  ;;  %vm574_vm10 = vcmp.lt.s32.totalorder %v439_v58, 69080  ;;  %v242_v18 = vld [vmem:[%s4665_s10 + $0x78] sm:$0xff] }
  0x78   : > { %4238 = vmatmul.msk.f32.vlgmr.msrb.gmra.mxu3 %vm565_vm15, %v4818_v34  ;;  %4236 = vmatmul.msk.f32.vlgmr.msrb.gmra.mxu1 %vm563_vm0, %v4822_v37  ;;  %v438_v34 = vadd.s32 %v4681_v12, %v302_v19  ;;  %v4909_v37 = vld.sshfl [vmem:[#allocation1 + $0x20] sm:$0xff pattern:$0x73625140]  ;;  %v1332_v45 = vld [vmem:[%s4651_s7 + $0x5e0] sm:$0x3] }
  0x79   : > { %2109 = vmatpush.xpose.msra.mxu2 %v1178_v3  ;;  %2069 = vmatpush.xpose.msra.mxu0 %v1176_v4  ;;  %765 = vst [vmem:[#allocation1 + $0x20] ss:$4 sm:$0xff] %v240_v38  ;;  %vm570_vm6 = vcmp.lt.s32.totalorder %v435_v33, 69080  ;;  %v4929_v49 = vld.sshfl [vmem:[#allocation1] sm:$0xff pattern:$0x73625140]  ;;  %v445_v4 = vadd.s32 %v4681_v12, %v309_v60 }
  0x7a   : > { %2129 = vmatpush.xpose.msra.mxu3 %v1179_v5  ;;  %2089 = vmatpush.xpose.msra.mxu1 %v1177_v6  ;;  %vm573_vm7 = vcmp.lt.s32.totalorder %v438_v34, 69080  ;;  %v4931_v50 = vld.sshfl [vmem:[#allocation1 + $0x18] sm:$0xff pattern:$0x73625140]  ;;  %v1325_v57 = vld [vmem:[%s4651_s7 + $0x5a8] sm:$0x3] }
  0x7b   : > { %v4934_v52 = vld.sshfl [vmem:[#allocation1 + $0x8] sm:$0xff pattern:$0x73625140]  ;;  %v308_v3 = vadd.s32 5760, %v4677_v9  ;;  %v1189_v8 = vld [vmem:[%s4651_s7 + $0x168] sm:$0xff]  ;;  %vm580_vm13 = vcmp.lt.s32.totalorder %v445_v4, 69080 }
  0x7c   : > { %v1190_v5 = vld [vmem:[%s4651_s7 + $0x170] sm:$0xff]  ;;  %v1188_v6 = vld [vmem:[%s4651_s7 + $0x160] sm:$0xff]  ;;  %v1329_v10 = vld [vmem:[%s4651_s7 + $0x5c8] sm:$0x3]  ;;  %v320_v4 = vadd.s32 7296, %v4677_v9 }
  0x7d   : > { %2188 = vmatpush.xpose.msrb.mxu2 %v1317_v7  ;;  %2148 = vmatpush.xpose.msrb.mxu0 %v1315_v13  ;;  %v1191_v7 = vld [vmem:[%s4651_s7 + $0x178] sm:$0xff]  ;;  %v446_v13 = vadd.s32 %v4681_v12, %v310_v2  ;;  %v444_v15 = vadd.s32 %v4681_v12, %v308_v3  ;;  %v1193_v36 = vld [vmem:[%s4651_s7 + $0x188] sm:$0xff]  ;;  %v1336_v2 = vld [vmem:[%s4651_s7 + $0x600] sm:$0x3]  ;;  %v322_v3 = vadd.s32 7552, %v4677_v9 }
  0x7e   : > { %2208 = vmatpush.xpose.msrb.mxu3 %v1318_v14  ;;  %2168 = vmatpush.xpose.msrb.mxu1 %v1316_v17  ;;  %v1327_v14 = vld [vmem:[%s4651_s7 + $0x5b8] sm:$0x3]  ;;  %v1328_v17 = vld [vmem:[%s4651_s7 + $0x5c0] sm:$0x3] }
  0x7f   : > { %4241 = vmatmul.msk.f32.vlgmr.msra.gmra.mxu2 %vm568_vm1, %v4830_v44  ;;  %4239 = vmatmul.msk.f32.vlgmr.msra.gmra.mxu0 %vm566_vm2, %v4834_v47  ;;  %v1186_v44 = vld [vmem:[%s4651_s7 + $0x150] sm:$0xff]  ;;  %v304_v47 = vadd.s32 5248, %v4677_v9  ;;  %vm581_vm15 = vcmp.lt.s32.totalorder %v446_v13, 69080  ;;  %vm579_vm0 = vcmp.lt.s32.totalorder %v444_v15, 69080  ;;  %v243_v34 = vld [vmem:[%s4665_s10 + $0x80] sm:$0xff] }
  0x80   : > { %4242 = vmatmul.msk.f32.vlgmr.msra.gmra.mxu3 %vm569_vm3, %v4836_v48  ;;  %4240 = vmatmul.msk.f32.vlgmr.msra.gmra.mxu1 %vm567_vm4, %v4840_v51  ;;  %v4927_v48 = vld.sshfl [vmem:[#allocation1 + $0x10] sm:$0xff pattern:$0x73625140]  ;;  %v1184_v51 = vld [vmem:[%s4651_s7 + $0x140] sm:$0xff] }
  0x81   : > { %2189 = vmatpush.xpose.msrb.mxu2 %v1182_v26  ;;  %2149 = vmatpush.xpose.msrb.mxu0 %v1180_v27  ;;  %774 = vst [vmem:[#allocation1] ss:$4 sm:$0xff] %v241_v53  ;;  %v440_v0 = vadd.s32 %v4681_v12, %v304_v47  ;;  %v4976_v19 = vld.sshfl [vmem:[#allocation1 + $0x30] sm:$0xff pattern:$0x73625140]  ;;  %v314_v26 = vadd.s32 6528, %v4677_v9 }
  0x82   : > { %2209 = vmatpush.xpose.msrb.mxu3 %v1183_v28  ;;  %2169 = vmatpush.xpose.msrb.mxu1 %v1181_v29  ;;  %v4978_v20 = vld.sshfl [vmem:[#allocation1 + $0x20] sm:$0xff pattern:$0x73625140]  ;;  %v4980_v21 = vld.sshfl [vmem:[#allocation1 + $0x38] sm:$0xff pattern:$0x73625140] }
  0x83   : > { %vm575_vm12 = vcmp.lt.s32.totalorder %v440_v0, 69080  ;;  %v312_v27 = vadd.s32 6272, %v4677_v9  ;;  %v1331_v43 = vld [vmem:[%s4651_s7 + $0x5d8] sm:$0x3]  ;;  %v318_v47 = vadd.s32 7040, %v4677_v9  ;;  %v1196_v53 = vld [vmem:[%s4651_s7 + $0x1a0] sm:$0xff] }
  0x84   : > { %v1335_v58 = vld [vmem:[%s4651_s7 + $0x5f8] sm:$0x3] }
  0x85   : > { %2268 = vmatpush.xpose.msra.mxu2 %v1321_v31  ;;  %2228 = vmatpush.xpose.msra.mxu0 %v1319_v35  ;;  %v1192_v31 = vld [vmem:[%s4651_s7 + $0x180] sm:$0xff]  ;;  %v1195_v35 = vld [vmem:[%s4651_s7 + $0x198] sm:$0xff]  ;;  %v454_v0 = vadd.s32 %v4681_v12, %v318_v47  ;;  %v330_v47 = vadd.s32 8576, %v4677_v9 }
  0x86   : > { %2288 = vmatpush.xpose.msra.mxu3 %v1322_v41  ;;  %2248 = vmatpush.xpose.msra.mxu1 %v1320_v42  ;;  %v1333_v41 = vld [vmem:[%s4651_s7 + $0x5e8] sm:$0x3]  ;;  %v1203_v15 = vld [vmem:[%s4651_s7 + $0x1d8] sm:$0xff] }
  0x87   : > { %4245 = vmatmul.msk.f32.vlgmr.msrb.gmra.mxu2 %vm572_vm5, %v4853_v61  ;;  %4243 = vmatmul.msk.f32.vlgmr.msrb.gmra.mxu0 %vm570_vm6, %v4855_v62  ;;  %v442_v61 = vadd.s32 %v4681_v12, %v306_v46  ;;  %v1326_v62 = vld [vmem:[%s4651_s7 + $0x5b0] sm:$0x3] }
  0x88   : > { %4246 = vmatmul.msk.f32.vlgmr.msrb.gmra.mxu3 %vm573_vm7, %v4857_v63  ;;  %4244 = vmatmul.msk.f32.vlgmr.msrb.gmra.mxu1 %vm571_vm8, %v4860_v1  ;;  %v1324_v63 = vld [vmem:[%s4651_s7 + $0x5a0] sm:$0x3]  ;;  %v307_v1 = vadd.s32 5632, %v4677_v9  ;;  %v4989_v28 = vld.sshfl [vmem:[#allocation1 + $0x10] sm:$0xff pattern:$0x73625140] }
  0x89   : > { %2269 = vmatpush.xpose.msra.mxu2 %v1186_v44  ;;  %2229 = vmatpush.xpose.msra.mxu0 %v1184_v51  ;;  %vm577_vm11 = vcmp.lt.s32.totalorder %v442_v61, 69080  ;;  %v4991_v29 = vld.sshfl [vmem:[#allocation1] sm:$0xff pattern:$0x73625140]  ;;  %v448_v44 = vadd.s32 %v4681_v12, %v312_v27  ;;  %v1198_v46 = vld [vmem:[%s4651_s7 + $0x1b0] sm:$0xff]  ;;  %v316_v51 = vadd.s32 6784, %v4677_v9 }
  0x8a   : > { %2289 = vmatpush.xpose.msra.mxu3 %v1187_v54  ;;  %2249 = vmatpush.xpose.msra.mxu1 %v1185_v55  ;;  %v443_v11 = vadd.s32 %v4681_v12, %v307_v1  ;;  %v4993_v30 = vld.sshfl [vmem:[#allocation1 + $0x18] sm:$0xff pattern:$0x73625140]  ;;  %v4996_v33 = vld.sshfl [vmem:[#allocation1 + $0x8] sm:$0xff pattern:$0x73625140] }
  0x8b   : > { %784 = vst [vmem:[#allocation1] ss:$4 sm:$0xff] %v243_v34  ;;  %vm583_vm4 = vcmp.lt.s32.totalorder %v448_v44, 69080  ;;  %v1199_v54 = vld [vmem:[%s4651_s7 + $0x1b8] sm:$0xff]  ;;  %v1197_v55 = vld [vmem:[%s4651_s7 + $0x1a8] sm:$0xff]  ;;  %vm589_vm7 = vcmp.lt.s32.totalorder %v454_v0, 69080 }
  0x8c   : > { %vm578_vm14 = vcmp.lt.s32.totalorder %v443_v11, 69080  ;;  %v326_v27 = vadd.s32 8064, %v4677_v9  ;;  %v1211_v0 = vld [vmem:[%s4651_s7 + $0x218] sm:$0xff] }
  0x8d   : > { %2348 = vmatpush.xpose.msrb.mxu2 %v1325_v57  ;;  %2308 = vmatpush.xpose.msrb.mxu0 %v1323_v59  ;;  %v1337_v57 = vld [vmem:[%s4651_s7 + $0x608] sm:$0x3]  ;;  %v244_v59 = vld [vmem:[%s4665_s10 + $0x88] sm:$0xff] }
  0x8e   : > { %2368 = vmatpush.xpose.msrb.mxu3 %v1326_v62  ;;  %2328 = vmatpush.xpose.msrb.mxu1 %v1324_v63  ;;  %v452_v63 = vadd.s32 %v4681_v12, %v316_v51  ;;  %v328_v51 = vadd.s32 8320, %v4677_v9 }
  0x8f   : > { %4249 = vmatmul.msk.f32.vlgmr.msra.gmra.mxu2 %vm576_vm9, %v4887_v22  ;;  %4247 = vmatmul.msk.f32.vlgmr.msra.gmra.mxu0 %vm574_vm10, %v4889_v23  ;;  %v4982_v22 = vld.sshfl [vmem:[#allocation1 + $0x28] sm:$0xff pattern:$0x73625140]  ;;  %v313_v23 = vadd.s32 6400, %v4677_v9 }
  0x90   : > { %4250 = vmatmul.msk.f32.vlgmr.msra.gmra.mxu3 %vm577_vm11, %v4891_v24  ;;  %4248 = vmatmul.msk.f32.vlgmr.msra.gmra.mxu1 %vm575_vm12, %v4893_v25  ;;  %775 = vst [vmem:[#allocation1 + $0x20] ss:$4 sm:$0xff] %v242_v18  ;;  %v1194_v24 = vld [vmem:[%s4651_s7 + $0x190] sm:$0xff]  ;;  %v311_v25 = vadd.s32 6144, %v4677_v9  ;;  %vm587_vm8 = vcmp.lt.s32.totalorder %v452_v63, 69080  ;;  %v458_v18 = vadd.s32 %v4681_v12, %v322_v3  ;;  %v1209_v63 = vld [vmem:[%s4651_s7 + $0x208] sm:$0xff] }
  0x91   : > { %2349 = vmatpush.xpose.msrb.mxu2 %v1190_v5  ;;  %2309 = vmatpush.xpose.msrb.mxu0 %v1188_v6  ;;  %v449_v38 = vadd.s32 %v4681_v12, %v313_v23  ;;  %v1202_v5 = vld [vmem:[%s4651_s7 + $0x1d0] sm:$0xff]  ;;  %v456_v23 = vadd.s32 %v4681_v12, %v320_v4  ;;  %v1348_v3 = vld [vmem:[%s4651_s7 + $0x660] sm:$0x3]  ;;  %v333_v4 = vadd.s32 8960, %v4677_v9 }
  0x92   : > { %2369 = vmatpush.xpose.msrb.mxu3 %v1191_v7  ;;  %2329 = vmatpush.xpose.msrb.mxu1 %v1189_v8  ;;  %v447_v42 = vadd.s32 %v4681_v12, %v311_v25  ;;  %v5053_v6 = vld.sshfl [vmem:[#allocation1 + $0x10] sm:$0xff pattern:$0x73625140]  ;;  %v5055_v7 = vld.sshfl [vmem:[#allocation1] sm:$0xff pattern:$0x73625140] }
  0x93   : > { %vm584_vm1 = vcmp.lt.s32.totalorder %v449_v38, 69080  ;;  %v5057_v8 = vld.sshfl [vmem:[#allocation1 + $0x18] sm:$0xff pattern:$0x73625140]  ;;  %vm593_vm11 = vcmp.lt.s32.totalorder %v458_v18, 69080  ;;  %vm591_vm12 = vcmp.lt.s32.totalorder %v456_v23, 69080  ;;  %v469_v23 = vadd.s32 %v4681_v12, %v333_v4 }
  0x94   : > { %vm582_vm2 = vcmp.lt.s32.totalorder %v447_v42, 69080  ;;  %v5061_v13 = vld.sshfl [vmem:[#allocation1 + $0x8] sm:$0xff pattern:$0x73625140] }
  0x95   : > { %2428 = vmatpush.xpose.msra.mxu2 %v1329_v10  ;;  %2388 = vmatpush.xpose.msra.mxu0 %v1327_v14  ;;  %v1200_v10 = vld [vmem:[%s4651_s7 + $0x1c0] sm:$0xff]  ;;  %v245_v14 = vld [vmem:[%s4665_s10 + $0x90] sm:$0xff] }
  0x96   : > { %2448 = vmatpush.xpose.msra.mxu3 %v1330_v16  ;;  %2408 = vmatpush.xpose.msra.mxu1 %v1328_v17  ;;  %v1201_v16 = vld [vmem:[%s4651_s7 + $0x1c8] sm:$0xff]  ;;  %794 = vst [vmem:[#allocation1] ss:$4 sm:$0xff] %v245_v14  ;;  %v1340_v25 = vld [vmem:[%s4651_s7 + $0x620] sm:$0x3] }
  0x97   : > { %4253 = vmatmul.msk.f32.vlgmr.msrb.gmra.mxu2 %vm580_vm13, %v4901_v32  ;;  %4251 = vmatmul.msk.f32.vlgmr.msrb.gmra.mxu0 %vm578_vm14, %v4909_v37  ;;  %v450_v32 = vadd.s32 %v4681_v12, %v314_v26  ;;  %v1334_v37 = vld [vmem:[%s4651_s7 + $0x5f0] sm:$0x3]  ;;  %v5034_v61 = vld.sshfl [vmem:[#allocation1 + $0x30] sm:$0xff pattern:$0x73625140]  ;;  %v325_v26 = vadd.s32 7936, %v4677_v9 }
  0x98   : > { %4254 = vmatmul.msk.f32.vlgmr.msrb.gmra.mxu3 %vm581_vm15, %v4916_v39  ;;  %4252 = vmatmul.msk.f32.vlgmr.msrb.gmra.mxu1 %vm579_vm0, %v4918_v40  ;;  %v317_v39 = vadd.s32 6912, %v4677_v9  ;;  %v315_v40 = vadd.s32 6656, %v4677_v9  ;;  %v5036_v62 = vld.sshfl [vmem:[#allocation1 + $0x20] sm:$0xff pattern:$0x73625140]  ;;  %v1204_v38 = vld [vmem:[%s4651_s7 + $0x1e0] sm:$0xff] }
  0x99   : > { %2429 = vmatpush.xpose.msra.mxu2 %v1194_v24  ;;  %2389 = vmatpush.xpose.msra.mxu0 %v1192_v31  ;;  %vm585_vm3 = vcmp.lt.s32.totalorder %v450_v32, 69080  ;;  %v5042_v1 = vld.sshfl [vmem:[#allocation1 + $0x38] sm:$0xff pattern:$0x73625140]  ;;  %v1341_v24 = vld [vmem:[%s4651_s7 + $0x628] sm:$0x3] }
  0x9a   : > { %2449 = vmatpush.xpose.msra.mxu3 %v1195_v35  ;;  %2409 = vmatpush.xpose.msra.mxu1 %v1193_v36  ;;  %v453_v56 = vadd.s32 %v4681_v12, %v317_v39  ;;  %v451_v60 = vadd.s32 %v4681_v12, %v315_v40  ;;  %v324_v31 = vadd.s32 7808, %v4677_v9  ;;  %v1207_v32 = vld [vmem:[%s4651_s7 + $0x1f8] sm:$0xff]  ;;  %v462_v39 = vadd.s32 %v4681_v12, %v326_v27  ;;  %v1212_v18 = vld [vmem:[%s4651_s7 + $0x220] sm:$0xff] }
  0x9b   : > { %v1343_v40 = vld [vmem:[%s4651_s7 + $0x638] sm:$0x3] }
  0x9c   : > { %vm588_vm5 = vcmp.lt.s32.totalorder %v453_v56, 69080  ;;  %vm586_vm6 = vcmp.lt.s32.totalorder %v451_v60, 69080  ;;  %vm597_vm15 = vcmp.lt.s32.totalorder %v462_v39, 69080  ;;  %v247_v60 = vld [vmem:[%s4665_s10 + $0xa0] sm:$0xff]  ;;  %v1218_v39 = vld [vmem:[%s4651_s7 + $0x250] sm:$0xff] }
  0x9d   : > { %2508 = vmatpush.xpose.msrb.mxu2 %v1333_v41  ;;  %2468 = vmatpush.xpose.msrb.mxu0 %v1331_v43  ;;  %v461_v41 = vadd.s32 %v4681_v12, %v325_v26  ;;  %v246_v43 = vld [vmem:[%s4665_s10 + $0x98] sm:$0xff]  ;;  %v1351_v27 = vld [vmem:[%s4651_s7 + $0x678] sm:$0x3] }
  0x9e   : > { %2528 = vmatpush.xpose.msrb.mxu3 %v1334_v37  ;;  %2488 = vmatpush.xpose.msrb.mxu1 %v1332_v45  ;;  %v1205_v37 = vld [vmem:[%s4651_s7 + $0x1e8] sm:$0xff]  ;;  %v5123_v56 = vld.sshfl [vmem:[#allocation1 + $0x18] sm:$0xff pattern:$0x73625140] }
  0x9f   : > { %4257 = vmatmul.msk.f32.vlgmr.msra.gmra.mxu2 %vm584_vm1, %v4927_v48  ;;  %4255 = vmatmul.msk.f32.vlgmr.msra.gmra.mxu0 %vm582_vm2, %v4929_v49  ;;  %v5044_v48 = vld.sshfl [vmem:[#allocation1 + $0x28] sm:$0xff pattern:$0x73625140]  ;;  %v1345_v45 = vld [vmem:[%s4651_s7 + $0x648] sm:$0x3]  ;;  %vm596_vm13 = vcmp.lt.s32.totalorder %v461_v41, 69080 }
  0xa0   : > { %4258 = vmatmul.msk.f32.vlgmr.msra.gmra.mxu3 %vm585_vm3, %v4931_v50  ;;  %4256 = vmatmul.msk.f32.vlgmr.msra.gmra.mxu1 %vm583_vm4, %v4934_v52  ;;  %v1338_v49 = vld [vmem:[%s4651_s7 + $0x610] sm:$0x3]  ;;  %785 = vst [vmem:[#allocation1 + $0x20] ss:$4 sm:$0xff] %v244_v59  ;;  %v321_v50 = vadd.s32 7424, %v4677_v9  ;;  %v319_v52 = vadd.s32 7168, %v4677_v9 }
  0xa1   : > { %2509 = vmatpush.xpose.msrb.mxu2 %v1198_v46  ;;  %2469 = vmatpush.xpose.msrb.mxu0 %v1196_v53  ;;  %v1344_v46 = vld [vmem:[%s4651_s7 + $0x640] sm:$0x3]  ;;  %v1210_v53 = vld [vmem:[%s4651_s7 + $0x210] sm:$0xff] }
  0xa2   : > { %2529 = vmatpush.xpose.msrb.mxu3 %v1199_v54  ;;  %2489 = vmatpush.xpose.msrb.mxu1 %v1197_v55  ;;  %v457_v11 = vadd.s32 %v4681_v12, %v321_v50  ;;  %v455_v17 = vadd.s32 %v4681_v12, %v319_v52  ;;  %v5119_v54 = vld.sshfl [vmem:[#allocation1 + $0x10] sm:$0xff pattern:$0x73625140]  ;;  %v5121_v55 = vld.sshfl [vmem:[#allocation1] sm:$0xff pattern:$0x73625140]  ;;  %v464_v50 = vadd.s32 %v4681_v12, %v328_v51 }
  0xa3   : > { %v5127_v59 = vld.sshfl [vmem:[#allocation1 + $0x8] sm:$0xff pattern:$0x73625140]  ;;  %v1349_v52 = vld [vmem:[%s4651_s7 + $0x668] sm:$0x3] }
  0xa4   : > { %vm592_vm9 = vcmp.lt.s32.totalorder %v457_v11, 69080  ;;  %vm590_vm10 = vcmp.lt.s32.totalorder %v455_v17, 69080  ;;  %804 = vst [vmem:[#allocation1] ss:$4 sm:$0xff] %v247_v60  ;;  %vm599_vm4 = vcmp.lt.s32.totalorder %v464_v50, 69080  ;;  %v332_v11 = vadd.s32 8832, %v4677_v9 }
  0xa5   : > { %2588 = vmatpush.xpose.msra.mxu2 %v1337_v57  ;;  %2548 = vmatpush.xpose.msra.mxu0 %v1335_v58  ;;  %v1208_v57 = vld [vmem:[%s4651_s7 + $0x200] sm:$0xff]  ;;  %v1219_v60 = vld [vmem:[%s4651_s7 + $0x258] sm:$0xff] }
  0xa6   : > { %2608 = vmatpush.xpose.msra.mxu3 %v1338_v49  ;;  %2568 = vmatpush.xpose.msra.mxu1 %v1336_v2  ;;  %v466_v2 = vadd.s32 %v4681_v12, %v330_v47  ;;  %v1355_v50 = vld [vmem:[%s4651_s7 + $0x698] sm:$0x3] }
  0xa7   : > { %4261 = vmatmul.msk.f32.vlgmr.msrb.gmra.mxu2 %vm588_vm5, %v4976_v19  ;;  %4259 = vmatmul.msk.f32.vlgmr.msrb.gmra.mxu0 %vm586_vm6, %v4978_v20  ;;  %v1339_v19 = vld [vmem:[%s4651_s7 + $0x618] sm:$0x3]  ;;  %v1342_v20 = vld [vmem:[%s4651_s7 + $0x630] sm:$0x3]  ;;  %vm604_vm5 = vcmp.lt.s32.totalorder %v469_v23, 69080 }
  0xa8   : > { %4262 = vmatmul.msk.f32.vlgmr.msrb.gmra.mxu3 %vm589_vm7, %v4980_v21  ;;  %4260 = vmatmul.msk.f32.vlgmr.msrb.gmra.mxu1 %vm587_vm8, %v4982_v22  ;;  %v323_v21 = vadd.s32 7680, %v4677_v9  ;;  %v1206_v22 = vld [vmem:[%s4651_s7 + $0x1f0] sm:$0xff]  ;;  %v5086_v34 = vld.sshfl [vmem:[#allocation1 + $0x30] sm:$0xff pattern:$0x73625140]  ;;  %vm601_vm3 = vcmp.lt.s32.totalorder %v466_v2, 69080 }
  0xa9   : > { %2589 = vmatpush.xpose.msra.mxu2 %v1202_v5  ;;  %2549 = vmatpush.xpose.msra.mxu0 %v1200_v10  ;;  %v5088_v35 = vld.sshfl [vmem:[#allocation1 + $0x20] sm:$0xff pattern:$0x73625140]  ;;  %v5090_v36 = vld.sshfl [vmem:[#allocation1 + $0x38] sm:$0xff pattern:$0x73625140] }
  0xaa   : > { %2609 = vmatpush.xpose.msra.mxu3 %v1203_v15  ;;  %2569 = vmatpush.xpose.msra.mxu1 %v1201_v16  ;;  %v5094_v42 = vld.sshfl [vmem:[#allocation1 + $0x28] sm:$0xff pattern:$0x73625140]  ;;  %v459_v44 = vadd.s32 %v4681_v12, %v323_v21  ;;  %v334_v10 = vadd.s32 9088, %v4677_v9  ;;  %v1353_v21 = vld [vmem:[%s4651_s7 + $0x688] sm:$0x3] }
  0xab   : > { %795 = vst [vmem:[#allocation1 + $0x20] ss:$4 sm:$0xff] %v246_v43  ;;  %v1214_v5 = vld [vmem:[%s4651_s7 + $0x230] sm:$0xff]  ;;  %v1357_v2 = vld [vmem:[%s4651_s7 + $0x6a8] sm:$0x3] }
  0xac   : > { %vm594_vm14 = vcmp.lt.s32.totalorder %v459_v44, 69080  ;;  %v336_v44 = vadd.s32 9344, %v4677_v9 }
  0xad   : > { %2668 = vmatpush.xpose.msrb.mxu2 %v1341_v24  ;;  %2628 = vmatpush.xpose.msrb.mxu0 %v1339_v19  ;;  %v248_v19 = vld [vmem:[%s4665_s10 + $0xa8] sm:$0xff] }
  0xae   : > { %2688 = vmatpush.xpose.msrb.mxu3 %v1342_v20  ;;  %2648 = vmatpush.xpose.msrb.mxu1 %v1340_v25  ;;  %v1215_v20 = vld [vmem:[%s4651_s7 + $0x238] sm:$0xff]  ;;  %v1213_v25 = vld [vmem:[%s4651_s7 + $0x228] sm:$0xff] }
  0xaf   : > { %4265 = vmatmul.msk.f32.vlgmr.msra.gmra.mxu2 %vm592_vm9, %v4989_v28  ;;  %4263 = vmatmul.msk.f32.vlgmr.msra.gmra.mxu0 %vm590_vm10, %v4991_v29  ;;  %v460_v28 = vadd.s32 %v4681_v12, %v324_v31  ;;  %v1346_v29 = vld [vmem:[%s4651_s7 + $0x650] sm:$0x3] }
  0xb0   : > { %4266 = vmatmul.msk.f32.vlgmr.msra.gmra.mxu3 %vm593_vm11, %v4993_v30  ;;  %4264 = vmatmul.msk.f32.vlgmr.msra.gmra.mxu1 %vm591_vm12, %v4996_v33  ;;  %v329_v30 = vadd.s32 8448, %v4677_v9  ;;  %v327_v33 = vadd.s32 8192, %v4677_v9 }
  0xb1   : > { %2669 = vmatpush.xpose.msrb.mxu2 %v1206_v22  ;;  %2629 = vmatpush.xpose.msrb.mxu0 %v1204_v38  ;;  %vm595_vm0 = vcmp.lt.s32.totalorder %v460_v28, 69080  ;;  %v470_v22 = vadd.s32 %v4681_v12, %v334_v10  ;;  %v1352_v38 = vld [vmem:[%s4651_s7 + $0x680] sm:$0x3] }
  0xb2   : > { %2689 = vmatpush.xpose.msrb.mxu3 %v1207_v32  ;;  %2649 = vmatpush.xpose.msrb.mxu1 %v1205_v37  ;;  %v465_v58 = vadd.s32 %v4681_v12, %v329_v30  ;;  %v463_v49 = vadd.s32 %v4681_v12, %v327_v33  ;;  %v5152_v14 = vld.sshfl [vmem:[#allocation1 + $0x30] sm:$0xff pattern:$0x73625140]  ;;  %v5154_v16 = vld.sshfl [vmem:[#allocation1 + $0x20] sm:$0xff pattern:$0x73625140] }
  0xb3   : > { %v5156_v17 = vld.sshfl [vmem:[#allocation1 + $0x38] sm:$0xff pattern:$0x73625140]  ;;  %v5160_v24 = vld.sshfl [vmem:[#allocation1 + $0x28] sm:$0xff pattern:$0x73625140] }
  0xb4   : > { %vm600_vm1 = vcmp.lt.s32.totalorder %v465_v58, 69080  ;;  %vm598_vm2 = vcmp.lt.s32.totalorder %v463_v49, 69080  ;;  %805 = vst [vmem:[#allocation1 + $0x20] ss:$4 sm:$0xff] %v248_v19  ;;  %v338_v37 = vadd.s32 9600, %v4677_v9  ;;  %vm605_vm7 = vcmp.lt.s32.totalorder %v470_v22, 69080 }
  0xb5   : > { %2748 = vmatpush.xpose.msra.mxu2 %v1345_v45  ;;  %2708 = vmatpush.xpose.msra.mxu0 %v1343_v40  ;;  %v5185_v40 = vld.sshfl [vmem:[#allocation1 + $0x10] sm:$0xff pattern:$0x73625140]  ;;  %v5189_v30 = vld.sshfl [vmem:[#allocation1 + $0x18] sm:$0xff pattern:$0x73625140]  ;;  %v472_v49 = vadd.s32 %v4681_v12, %v336_v44 }
  0xb6   : > { %2768 = vmatpush.xpose.msra.mxu3 %v1346_v29  ;;  %2728 = vmatpush.xpose.msra.mxu1 %v1344_v46  ;;  %v5187_v46 = vld.sshfl [vmem:[#allocation1] sm:$0xff pattern:$0x73625140]  ;;  %v1216_v33 = vld [vmem:[%s4651_s7 + $0x240] sm:$0xff]  ;;  %v344_v44 = vadd.s32 10368, %v4677_v9 }
  0xb7   : > { %4269 = vmatmul.msk.f32.vlgmr.msrb.gmra.mxu2 %vm596_vm13, %v5034_v61  ;;  %4267 = vmatmul.msk.f32.vlgmr.msrb.gmra.mxu0 %vm594_vm14, %v5036_v62  ;;  %v1347_v61 = vld [vmem:[%s4651_s7 + $0x658] sm:$0x3]  ;;  %v1350_v62 = vld [vmem:[%s4651_s7 + $0x670] sm:$0x3]  ;;  %vm607_vm12 = vcmp.lt.s32.totalorder %v472_v49, 69080  ;;  %v1220_v19 = vld [vmem:[%s4651_s7 + $0x260] sm:$0xff] }
  0xb8   : > { %4270 = vmatmul.msk.f32.vlgmr.msrb.gmra.mxu3 %vm597_vm15, %v5042_v1  ;;  %4268 = vmatmul.msk.f32.vlgmr.msrb.gmra.mxu1 %vm595_vm0, %v5044_v48  ;;  %v331_v1 = vadd.s32 8704, %v4677_v9  ;;  %v1223_v22 = vld [vmem:[%s4651_s7 + $0x278] sm:$0xff] }
  0xb9   : > { %2749 = vmatpush.xpose.msra.mxu2 %v1210_v53  ;;  %2709 = vmatpush.xpose.msra.mxu0 %v1208_v57  ;;  %v5194_v53 = vld.sshfl [vmem:[#allocation1 + $0x8] sm:$0xff pattern:$0x73625140]  ;;  %v249_v57 = vld [vmem:[%s4665_s10 + $0xb0] sm:$0xff] }
  0xba   : > { %2769 = vmatpush.xpose.msra.mxu3 %v1211_v0  ;;  %2729 = vmatpush.xpose.msra.mxu1 %v1209_v63  ;;  %v467_v26 = vadd.s32 %v4681_v12, %v331_v1  ;;  %v1217_v0 = vld [vmem:[%s4651_s7 + $0x248] sm:$0xff]  ;;  %v474_v63 = vadd.s32 %v4681_v12, %v338_v37  ;;  %814 = vst [vmem:[#allocation1] ss:$4 sm:$0xff] %v249_v57  ;;  %v1222_v1 = vld [vmem:[%s4651_s7 + $0x270] sm:$0xff]  ;;  %v346_v37 = vadd.s32 10624, %v4677_v9  ;;  %v1224_v57 = vld [vmem:[%s4651_s7 + $0x280] sm:$0xff] }
  0xbb   : > { %v5218_v10 = vld.sshfl [vmem:[#allocation1 + $0x30] sm:$0xff pattern:$0x73625140]  ;;  %v5222_v23 = vld.sshfl [vmem:[#allocation1 + $0x38] sm:$0xff pattern:$0x73625140] }
  0xbc   : > { %v1431_v48 = vpop.f32.mrf.mxu0  ;;  %vm602_vm6 = vcmp.lt.s32.totalorder %v467_v26, 69080  ;;  %vm609_vm11 = vcmp.lt.s32.totalorder %v474_v63, 69080  ;;  %v250_v26 = vld [vmem:[%s4665_s10 + $0xb8] sm:$0xff]  ;;  %v251_v63 = vld [vmem:[%s4665_s10 + $0xc0] sm:$0xff] }
  0xbd   : > { %2828 = vmatpush.xpose.msrb.mxu2 %v1349_v52  ;;  %2788 = vmatpush.xpose.msrb.mxu0 %v1347_v61  ;;  %v1451_v15 = vpop.f32.mrf.mxu1 }
  0xbe   : > { %2848 = vmatpush.xpose.msrb.mxu3 %v1350_v62  ;;  %2808 = vmatpush.xpose.msrb.mxu1 %v1348_v3  ;;  %v1452_v31 = vadd.f32 %v1451_v15, %v1431_v48  ;;  %v341_v62 = vadd.s32 9984, %v4677_v9  ;;  %v342_v48 = vadd.s32 10112, %v4677_v9 }
  0xbf   : > { %4273 = vmatmul.msk.f32.vlgmr.msra.gmra.mxu2 %vm600_vm1, %v5053_v6  ;;  %4271 = vmatmul.msk.f32.vlgmr.msra.gmra.mxu0 %vm598_vm2, %v5055_v7  ;;  %v468_v6 = vadd.s32 %v4681_v12, %v332_v11  ;;  %v1354_v7 = vld [vmem:[%s4651_s7 + $0x690] sm:$0x3] }
  0xc0   : > { %4274 = vmatmul.msk.f32.vlgmr.msra.gmra.mxu3 %vm601_vm3, %v5057_v8  ;;  %4272 = vmatmul.msk.f32.vlgmr.msra.gmra.mxu1 %vm599_vm4, %v5061_v13  ;;  %v337_v8 = vadd.s32 9472, %v4677_v9  ;;  %v335_v13 = vadd.s32 9216, %v4677_v9 }
  0xc1   : > { %2829 = vmatpush.xpose.msrb.mxu2 %v1214_v5  ;;  %2789 = vmatpush.xpose.msrb.mxu0 %v1212_v18  ;;  %vm603_vm8 = vcmp.lt.s32.totalorder %v468_v6, 69080  ;;  %v340_v5 = vadd.s32 9856, %v4677_v9  ;;  %v5220_v18 = vld.sshfl [vmem:[#allocation1 + $0x20] sm:$0xff pattern:$0x73625140] }
  0xc2   : > { %v1471_v41 = vpop.f32.mrf.mxu2  ;;  %2849 = vmatpush.xpose.msrb.mxu3 %v1215_v20  ;;  %2809 = vmatpush.xpose.msrb.mxu1 %v1213_v25  ;;  %v473_v47 = vadd.s32 %v4681_v12, %v337_v8  ;;  %v471_v51 = vadd.s32 %v4681_v12, %v335_v13  ;;  %v477_v20 = vadd.s32 %v4681_v12, %v341_v62  ;;  %v5226_v25 = vld.sshfl [vmem:[#allocation1 + $0x28] sm:$0xff pattern:$0x73625140] }
  0xc3   : > { %v1472_v43 = vadd.f32 %v1471_v41, %v1452_v31  ;;  %v1491_v32 = vpop.f32.mrf.mxu3  ;;  %815 = vst [vmem:[#allocation1 + $0x20] ss:$4 sm:$0xff] %v250_v26  ;;  %v1361_v31 = vld [vmem:[%s4651_s7 + $0x6c8] sm:$0x3]  ;;  %v1360_v8 = vld [vmem:[%s4651_s7 + $0x6c0] sm:$0x3] }
  0xc4   : > { %v1511_v45 = vpop.f32.mrf.mxu0  ;;  %vm608_vm9 = vcmp.lt.s32.totalorder %v473_v47, 69080  ;;  %vm606_vm10 = vcmp.lt.s32.totalorder %v471_v51, 69080  ;;  %vm612_vm13 = vcmp.lt.s32.totalorder %v477_v20, 69080  ;;  %v5253_v47 = vld.sshfl [vmem:[#allocation1] sm:$0xff pattern:$0x73625140] }
  0xc5   : > { %2908 = vmatpush.xpose.msra.mxu2 %v1353_v21  ;;  %2868 = vmatpush.xpose.msra.mxu0 %v1351_v27  ;;  %v1492_v28 = vadd.f32 %v1491_v32, %v1472_v43  ;;  %v1531_v29 = vpop.f32.mrf.mxu1  ;;  %v1221_v27 = vld [vmem:[%s4651_s7 + $0x268] sm:$0xff]  ;;  %v5255_v51 = vld.sshfl [vmem:[#allocation1 + $0x18] sm:$0xff pattern:$0x73625140] }
  0xc6   : > { %2928 = vmatpush.xpose.msra.mxu3 %v1354_v7  ;;  %2888 = vmatpush.xpose.msra.mxu1 %v1352_v38  ;;  %v478_v7 = vadd.s32 %v4681_v12, %v342_v48  ;;  %v1359_v38 = vld [vmem:[%s4651_s7 + $0x6b8] sm:$0x3]  ;;  %v350_v48 = vadd.s32 11136, %v4677_v9 }
  0xc7   : > { %v1512_v58 = vadd.f32 %v1511_v45, %v1492_v28  ;;  %4277 = vmatmul.msk.f32.vlgmr.msrb.gmra.mxu2 %vm604_vm5, %v5086_v34  ;;  %4275 = vmatmul.msk.f32.vlgmr.msrb.gmra.mxu0 %vm602_vm6, %v5088_v35  ;;  %v1358_v34 = vld [vmem:[%s4651_s7 + $0x6b0] sm:$0x3]  ;;  %v1356_v35 = vld [vmem:[%s4651_s7 + $0x6a0] sm:$0x3] }
  0xc8   : > { %4278 = vmatmul.msk.f32.vlgmr.msrb.gmra.mxu3 %vm605_vm7, %v5090_v36  ;;  %4276 = vmatmul.msk.f32.vlgmr.msrb.gmra.mxu1 %vm603_vm8, %v5094_v42  ;;  %v339_v42 = vadd.s32 9728, %v4677_v9  ;;  %vm613_vm15 = vcmp.lt.s32.totalorder %v478_v7, 69080  ;;  %v5251_v28 = vld.sshfl [vmem:[#allocation1 + $0x10] sm:$0xff pattern:$0x73625140] }
  0xc9   : > { %v1532_v52 = vadd.f32 %v1531_v29, %v1512_v58  ;;  %2909 = vmatpush.xpose.msra.mxu2 %v1218_v39  ;;  %2869 = vmatpush.xpose.msra.mxu0 %v1216_v33  ;;  %v1226_v39 = vld [vmem:[%s4651_s7 + $0x290] sm:$0xff]  ;;  %v1231_v7 = vld [vmem:[%s4651_s7 + $0x2b8] sm:$0xff] }
  0xca   : > { %v1551_v61 = vpop.f32.mrf.mxu2  ;;  %2929 = vmatpush.xpose.msra.mxu3 %v1219_v60  ;;  %2889 = vmatpush.xpose.msra.mxu1 %v1217_v0  ;;  %v475_v6 = vadd.s32 %v4681_v12, %v339_v42  ;;  %v5260_v0 = vld.sshfl [vmem:[#allocation1 + $0x8] sm:$0xff pattern:$0x73625140]  ;;  %v5286_v20 = vld.sshfl [vmem:[#allocation1 + $0x20] sm:$0xff pattern:$0x73625140] }
  0xcb   : > { %v1552_v3 = vadd.f32 %v1551_v61, %v1532_v52  ;;  %v1571_v36 = vpop.f32.mrf.mxu3  ;;  %v482_v52 = vadd.s32 %v4681_v12, %v346_v37  ;;  %824 = vst [vmem:[#allocation1] ss:$4 sm:$0xff] %v251_v63  ;;  %v1363_v61 = vld [vmem:[%s4651_s7 + $0x6d8] sm:$0x3]  ;;  %v354_v37 = vadd.s32 11648, %v4677_v9  ;;  %v1232_v63 = vld [vmem:[%s4651_s7 + $0x2c0] sm:$0xff] }
  0xcc   : > { %v1591_v4 = vpop.f32.mrf.mxu0  ;;  %vm610_vm14 = vcmp.lt.s32.totalorder %v475_v6, 69080  ;;  %v5288_v26 = vld.sshfl [vmem:[#allocation1 + $0x38] sm:$0xff pattern:$0x73625140]  ;;  %v252_v6 = vld [vmem:[%s4665_s10 + $0xc8] sm:$0xff] }
  0xcd   : > { %2988 = vmatpush.xpose.msrb.mxu2 %v1357_v2  ;;  %2948 = vmatpush.xpose.msrb.mxu0 %v1355_v50  ;;  %v1572_v11 = vadd.f32 %v1571_v36, %v1552_v3  ;;  %v1611_v15 = vpop.f32.mrf.mxu1  ;;  %v1227_v2 = vld [vmem:[%s4651_s7 + $0x298] sm:$0xff]  ;;  %v1225_v50 = vld [vmem:[%s4651_s7 + $0x288] sm:$0xff]  ;;  %v349_v36 = vadd.s32 11008, %v4677_v9  ;;  %vm617_vm3 = vcmp.lt.s32.totalorder %v482_v52, 69080 }
  0xce   : > { %3008 = vmatpush.xpose.msrb.mxu3 %v1358_v34  ;;  %2968 = vmatpush.xpose.msrb.mxu1 %v1356_v35  ;;  %v480_v34 = vadd.s32 %v4681_v12, %v344_v44  ;;  %v1365_v35 = vld [vmem:[%s4651_s7 + $0x6e8] sm:$0x3]  ;;  %v352_v44 = vadd.s32 11392, %v4677_v9 }
  0xcf   : > { %v1592_v21 = vadd.f32 %v1591_v4, %v1572_v11  ;;  %4281 = vmatmul.msk.f32.vlgmr.msra.gmra.mxu2 %vm608_vm9, %v5119_v54  ;;  %4279 = vmatmul.msk.f32.vlgmr.msra.gmra.mxu0 %vm606_vm10, %v5121_v55  ;;  %v476_v54 = vadd.s32 %v4681_v12, %v340_v5  ;;  %v1362_v55 = vld [vmem:[%s4651_s7 + $0x6d0] sm:$0x3]  ;;  %v348_v5 = vadd.s32 10880, %v4677_v9  ;;  %v5284_v11 = vld.sshfl [vmem:[#allocation1 + $0x30] sm:$0xff pattern:$0x73625140] }
  0xd0   : > { %4282 = vmatmul.msk.f32.vlgmr.msra.gmra.mxu3 %vm609_vm11, %v5123_v56  ;;  %4280 = vmatmul.msk.f32.vlgmr.msra.gmra.mxu1 %vm607_vm12, %v5127_v59  ;;  %v345_v56 = vadd.s32 10496, %v4677_v9  ;;  %v343_v59 = vadd.s32 10240, %v4677_v9  ;;  %vm615_vm4 = vcmp.lt.s32.totalorder %v480_v34, 69080  ;;  %v253_v52 = vld [vmem:[%s4665_s10 + $0xd0] sm:$0xff] }
  0xd1   : > { %v1612_v41 = vadd.f32 %v1611_v15, %v1592_v21  ;;  %2989 = vmatpush.xpose.msrb.mxu2 %v1222_v1  ;;  %2949 = vmatpush.xpose.msrb.mxu0 %v1220_v19  ;;  %vm611_vm0 = vcmp.lt.s32.totalorder %v476_v54, 69080  ;;  %v1230_v1 = vld [vmem:[%s4651_s7 + $0x2b0] sm:$0xff]  ;;  %v1228_v21 = vld [vmem:[%s4651_s7 + $0x2a0] sm:$0xff] }
  0xd2   : > { %v1631_v13 = vpop.f32.mrf.mxu2  ;;  %3009 = vmatpush.xpose.msrb.mxu3 %v1223_v22  ;;  %2969 = vmatpush.xpose.msrb.mxu1 %v1221_v27  ;;  %v481_v58 = vadd.s32 %v4681_v12, %v345_v56  ;;  %v479_v60 = vadd.s32 %v4681_v12, %v343_v59  ;;  %v485_v22 = vadd.s32 %v4681_v12, %v349_v36  ;;  %v5292_v27 = vld.sshfl [vmem:[#allocation1 + $0x28] sm:$0xff pattern:$0x73625140] }
  0xd3   : > { %v1632_v43 = vadd.f32 %v1631_v13, %v1612_v41  ;;  %v1651_v32 = vpop.f32.mrf.mxu3  ;;  %825 = vst [vmem:[#allocation1 + $0x20] ss:$4 sm:$0xff] %v252_v6  ;;  %v1369_v41 = vld [vmem:[%s4651_s7 + $0x708] sm:$0x3]  ;;  %v1368_v56 = vld [vmem:[%s4651_s7 + $0x700] sm:$0x3] }
  0xd4   : > { %v1671_v45 = vpop.f32.mrf.mxu0  ;;  %vm616_vm1 = vcmp.lt.s32.totalorder %v481_v58, 69080  ;;  %vm614_vm2 = vcmp.lt.s32.totalorder %v479_v60, 69080  ;;  %vm620_vm5 = vcmp.lt.s32.totalorder %v485_v22, 69080  ;;  %v5319_v58 = vld.sshfl [vmem:[#allocation1] sm:$0xff pattern:$0x73625140] }
  0xd5   : > { %3068 = vmatpush.xpose.msra.mxu2 %v1361_v31  ;;  %3028 = vmatpush.xpose.msra.mxu0 %v1359_v38  ;;  %v1652_v29 = vadd.f32 %v1651_v32, %v1632_v43  ;;  %v1691_v33 = vpop.f32.mrf.mxu1  ;;  %v1229_v38 = vld [vmem:[%s4651_s7 + $0x2a8] sm:$0xff]  ;;  %v5321_v60 = vld.sshfl [vmem:[#allocation1 + $0x18] sm:$0xff pattern:$0x73625140] }
  0xd6   : > { %3088 = vmatpush.xpose.msra.mxu3 %v1362_v55  ;;  %3048 = vmatpush.xpose.msra.mxu1 %v1360_v8  ;;  %v486_v55 = vadd.s32 %v4681_v12, %v350_v48  ;;  %v1367_v8 = vld [vmem:[%s4651_s7 + $0x6f8] sm:$0x3]  ;;  %v358_v48 = vadd.s32 12160, %v4677_v9 }
  0xd7   : > { %v1672_v49 = vadd.f32 %v1671_v45, %v1652_v29  ;;  %4285 = vmatmul.msk.f32.vlgmr.msrb.gmra.mxu2 %vm612_vm13, %v5152_v14  ;;  %4283 = vmatmul.msk.f32.vlgmr.msrb.gmra.mxu0 %vm610_vm14, %v5154_v16  ;;  %v1366_v14 = vld [vmem:[%s4651_s7 + $0x6f0] sm:$0x3]  ;;  %v1364_v16 = vld [vmem:[%s4651_s7 + $0x6e0] sm:$0x3] }
  0xd8   : > { %4286 = vmatmul.msk.f32.vlgmr.msrb.gmra.mxu3 %vm613_vm15, %v5156_v17  ;;  %4284 = vmatmul.msk.f32.vlgmr.msrb.gmra.mxu1 %vm611_vm0, %v5160_v24  ;;  %v347_v24 = vadd.s32 10752, %v4677_v9  ;;  %vm621_vm7 = vcmp.lt.s32.totalorder %v486_v55, 69080  ;;  %v5317_v29 = vld.sshfl [vmem:[#allocation1 + $0x10] sm:$0xff pattern:$0x73625140] }
  0xd9   : > { %v1692_v62 = vadd.f32 %v1691_v33, %v1672_v49  ;;  %3069 = vmatpush.xpose.msra.mxu2 %v1226_v39  ;;  %3029 = vmatpush.xpose.msra.mxu0 %v1224_v57  ;;  %v1234_v39 = vld [vmem:[%s4651_s7 + $0x2d0] sm:$0xff]  ;;  %v1239_v55 = vld [vmem:[%s4651_s7 + $0x2f8] sm:$0xff] }
  0xda   : > { %v1711_v3 = vpop.f32.mrf.mxu2  ;;  %3089 = vmatpush.xpose.msra.mxu3 %v1227_v2  ;;  %3049 = vmatpush.xpose.msra.mxu1 %v1225_v50  ;;  %v483_v54 = vadd.s32 %v4681_v12, %v347_v24  ;;  %v5326_v50 = vld.sshfl [vmem:[#allocation1 + $0x8] sm:$0xff pattern:$0x73625140]  ;;  %v5352_v22 = vld.sshfl [vmem:[#allocation1 + $0x20] sm:$0xff pattern:$0x73625140] }
  0xdb   : > { %v1712_v42 = vadd.f32 %v1711_v3, %v1692_v62  ;;  %v1731_v17 = vpop.f32.mrf.mxu3  ;;  %v490_v62 = vadd.s32 %v4681_v12, %v354_v37  ;;  %834 = vst [vmem:[#allocation1] ss:$4 sm:$0xff] %v253_v52  ;;  %v1371_v3 = vld [vmem:[%s4651_s7 + $0x718] sm:$0x3]  ;;  %v362_v37 = vadd.s32 12672, %v4677_v9  ;;  %v1240_v52 = vld [vmem:[%s4651_s7 + $0x300] sm:$0xff] }
  0xdc   : > { %v1751_v4 = vpop.f32.mrf.mxu0  ;;  %vm618_vm6 = vcmp.lt.s32.totalorder %v483_v54, 69080  ;;  %v5354_v6 = vld.sshfl [vmem:[#allocation1 + $0x38] sm:$0xff pattern:$0x73625140] }
  0xdd   : > { %3148 = vmatpush.xpose.msrb.mxu2 %v1365_v35  ;;  %3108 = vmatpush.xpose.msrb.mxu0 %v1363_v61  ;;  %v1732_v15 = vadd.f32 %v1731_v17, %v1712_v42  ;;  %v1771_v19 = vpop.f32.mrf.mxu1  ;;  %v1235_v35 = vld [vmem:[%s4651_s7 + $0x2d8] sm:$0xff]  ;;  %v1233_v61 = vld [vmem:[%s4651_s7 + $0x2c8] sm:$0xff]  ;;  %v357_v17 = vadd.s32 12032, %v4677_v9  ;;  %vm625_vm11 = vcmp.lt.s32.totalorder %v490_v62, 69080  ;;  %v254_v54 = vld [vmem:[%s4665_s10 + $0xd8] sm:$0xff] }
  0xde   : > { %3168 = vmatpush.xpose.msrb.mxu3 %v1366_v14  ;;  %3128 = vmatpush.xpose.msrb.mxu1 %v1364_v16  ;;  %v488_v14 = vadd.s32 %v4681_v12, %v352_v44  ;;  %v1373_v16 = vld [vmem:[%s4651_s7 + $0x728] sm:$0x3]  ;;  %v360_v44 = vadd.s32 12416, %v4677_v9 }
  0xdf   : > { %v1752_v31 = vadd.f32 %v1751_v4, %v1732_v15  ;;  %4289 = vmatmul.msk.f32.vlgmr.msra.gmra.mxu2 %vm616_vm1, %v5185_v40  ;;  %4287 = vmatmul.msk.f32.vlgmr.msra.gmra.mxu0 %vm614_vm2, %v5187_v46  ;;  %v484_v40 = vadd.s32 %v4681_v12, %v348_v5  ;;  %v1370_v46 = vld [vmem:[%s4651_s7 + $0x710] sm:$0x3]  ;;  %v356_v5 = vadd.s32 11904, %v4677_v9  ;;  %v5350_v15 = vld.sshfl [vmem:[#allocation1 + $0x30] sm:$0xff pattern:$0x73625140] }
  0xe0   : > { %4290 = vmatmul.msk.f32.vlgmr.msra.gmra.mxu3 %vm617_vm3, %v5189_v30  ;;  %4288 = vmatmul.msk.f32.vlgmr.msra.gmra.mxu1 %vm615_vm4, %v5194_v53  ;;  %v353_v30 = vadd.s32 11520, %v4677_v9  ;;  %v351_v53 = vadd.s32 11264, %v4677_v9  ;;  %vm623_vm12 = vcmp.lt.s32.totalorder %v488_v14, 69080  ;;  %v255_v62 = vld [vmem:[%s4665_s10 + $0xe0] sm:$0xff] }
  0xe1   : > { %v1772_v13 = vadd.f32 %v1771_v19, %v1752_v31  ;;  %3149 = vmatpush.xpose.msrb.mxu2 %v1230_v1  ;;  %3109 = vmatpush.xpose.msrb.mxu0 %v1228_v21  ;;  %vm619_vm8 = vcmp.lt.s32.totalorder %v484_v40, 69080  ;;  %v1238_v1 = vld [vmem:[%s4651_s7 + $0x2f0] sm:$0xff]  ;;  %v1236_v31 = vld [vmem:[%s4651_s7 + $0x2e0] sm:$0xff] }
  0xe2   : > { %v1791_v59 = vpop.f32.mrf.mxu2  ;;  %3169 = vmatpush.xpose.msrb.mxu3 %v1231_v7  ;;  %3129 = vmatpush.xpose.msrb.mxu1 %v1229_v38  ;;  %v489_v49 = vadd.s32 %v4681_v12, %v353_v30  ;;  %v487_v2 = vadd.s32 %v4681_v12, %v351_v53  ;;  %v493_v7 = vadd.s32 %v4681_v12, %v357_v17  ;;  %v5358_v38 = vld.sshfl [vmem:[#allocation1 + $0x28] sm:$0xff pattern:$0x73625140] }
  0xe3   : > { %v1792_v43 = vadd.f32 %v1791_v59, %v1772_v13  ;;  %v1811_v32 = vpop.f32.mrf.mxu3  ;;  %835 = vst [vmem:[#allocation1 + $0x20] ss:$4 sm:$0xff] %v254_v54  ;;  %v1377_v13 = vld [vmem:[%s4651_s7 + $0x748] sm:$0x3]  ;;  %v1376_v30 = vld [vmem:[%s4651_s7 + $0x740] sm:$0x3] }
  0xe4   : > { %v1831_v45 = vpop.f32.mrf.mxu0  ;;  %vm624_vm9 = vcmp.lt.s32.totalorder %v489_v49, 69080  ;;  %vm622_vm10 = vcmp.lt.s32.totalorder %v487_v2, 69080  ;;  %vm628_vm13 = vcmp.lt.s32.totalorder %v493_v7, 69080  ;;  %v5385_v49 = vld.sshfl [vmem:[#allocation1] sm:$0xff pattern:$0x73625140] }
  0xe5   : > { %3228 = vmatpush.xpose.msra.mxu2 %v1369_v41  ;;  %3188 = vmatpush.xpose.msra.mxu0 %v1367_v8  ;;  %v1812_v33 = vadd.f32 %v1811_v32, %v1792_v43  ;;  %v1851_v57 = vpop.f32.mrf.mxu1  ;;  %v1237_v8 = vld [vmem:[%s4651_s7 + $0x2e8] sm:$0xff]  ;;  %v5387_v2 = vld.sshfl [vmem:[#allocation1 + $0x18] sm:$0xff pattern:$0x73625140] }
  0xe6   : > { %3248 = vmatpush.xpose.msra.mxu3 %v1370_v46  ;;  %3208 = vmatpush.xpose.msra.mxu1 %v1368_v56  ;;  %v494_v46 = vadd.s32 %v4681_v12, %v358_v48  ;;  %v1375_v56 = vld [vmem:[%s4651_s7 + $0x738] sm:$0x3]  ;;  %v366_v48 = vadd.s32 13184, %v4677_v9 }
  0xe7   : > { %v1832_v34 = vadd.f32 %v1831_v45, %v1812_v33  ;;  %4293 = vmatmul.msk.f32.vlgmr.msrb.gmra.mxu2 %vm620_vm5, %v5218_v10  ;;  %4291 = vmatmul.msk.f32.vlgmr.msrb.gmra.mxu0 %vm618_vm6, %v5220_v18  ;;  %v1374_v10 = vld [vmem:[%s4651_s7 + $0x730] sm:$0x3]  ;;  %v1372_v18 = vld [vmem:[%s4651_s7 + $0x720] sm:$0x3] }
  0xe8   : > { %4294 = vmatmul.msk.f32.vlgmr.msrb.gmra.mxu3 %vm621_vm7, %v5222_v23  ;;  %4292 = vmatmul.msk.f32.vlgmr.msrb.gmra.mxu1 %vm619_vm8, %v5226_v25  ;;  %v355_v25 = vadd.s32 11776, %v4677_v9  ;;  %vm629_vm15 = vcmp.lt.s32.totalorder %v494_v46, 69080  ;;  %v5383_v33 = vld.sshfl [vmem:[#allocation1 + $0x10] sm:$0xff pattern:$0x73625140] }
  0xe9   : > { %v1852_v36 = vadd.f32 %v1851_v57, %v1832_v34  ;;  %3229 = vmatpush.xpose.msra.mxu2 %v1234_v39  ;;  %3189 = vmatpush.xpose.msra.mxu0 %v1232_v63  ;;  %v1242_v39 = vld [vmem:[%s4651_s7 + $0x310] sm:$0xff]  ;;  %v1247_v46 = vld [vmem:[%s4651_s7 + $0x338] sm:$0xff] }
  0xea   : > { %v1871_v42 = vpop.f32.mrf.mxu2  ;;  %3249 = vmatpush.xpose.msra.mxu3 %v1235_v35  ;;  %3209 = vmatpush.xpose.msra.mxu1 %v1233_v61  ;;  %v491_v40 = vadd.s32 %v4681_v12, %v355_v25  ;;  %v5392_v61 = vld.sshfl [vmem:[#allocation1 + $0x8] sm:$0xff pattern:$0x73625140]  ;;  %v5418_v7 = vld.sshfl [vmem:[#allocation1 + $0x20] sm:$0xff pattern:$0x73625140] }
  0xeb   : > { %v1872_v24 = vadd.f32 %v1871_v42, %v1852_v36  ;;  %v1891_v23 = vpop.f32.mrf.mxu3  ;;  %v498_v36 = vadd.s32 %v4681_v12, %v362_v37  ;;  %844 = vst [vmem:[#allocation1] ss:$4 sm:$0xff] %v255_v62  ;;  %v1379_v42 = vld [vmem:[%s4651_s7 + $0x758] sm:$0x3]  ;;  %v370_v37 = vadd.s32 13696, %v4677_v9  ;;  %v1248_v62 = vld [vmem:[%s4651_s7 + $0x340] sm:$0xff] }
  0xec   : > { %v1911_v4 = vpop.f32.mrf.mxu0  ;;  %vm626_vm14 = vcmp.lt.s32.totalorder %v491_v40, 69080  ;;  %v5420_v54 = vld.sshfl [vmem:[#allocation1 + $0x38] sm:$0xff pattern:$0x73625140]  ;;  %v256_v40 = vld [vmem:[%s4665_s10 + $0xe8] sm:$0xff] }
  0xed   : > { %3308 = vmatpush.xpose.msrb.mxu2 %v1373_v16  ;;  %3268 = vmatpush.xpose.msrb.mxu0 %v1371_v3  ;;  %v1892_v19 = vadd.f32 %v1891_v23, %v1872_v24  ;;  %v1931_v21 = vpop.f32.mrf.mxu1  ;;  %v1243_v16 = vld [vmem:[%s4651_s7 + $0x318] sm:$0xff]  ;;  %v1241_v3 = vld [vmem:[%s4651_s7 + $0x308] sm:$0xff]  ;;  %v365_v23 = vadd.s32 13056, %v4677_v9  ;;  %vm633_vm3 = vcmp.lt.s32.totalorder %v498_v36, 69080 }
  0xee   : > { %3328 = vmatpush.xpose.msrb.mxu3 %v1374_v10  ;;  %3288 = vmatpush.xpose.msrb.mxu1 %v1372_v18  ;;  %v496_v10 = vadd.s32 %v4681_v12, %v360_v44  ;;  %v1381_v18 = vld [vmem:[%s4651_s7 + $0x768] sm:$0x3]  ;;  %v368_v44 = vadd.s32 13440, %v4677_v9 }
  0xef   : > { %v1912_v41 = vadd.f32 %v1911_v4, %v1892_v19  ;;  %4297 = vmatmul.msk.f32.vlgmr.msra.gmra.mxu2 %vm624_vm9, %v5251_v28  ;;  %4295 = vmatmul.msk.f32.vlgmr.msra.gmra.mxu0 %vm622_vm10, %v5253_v47  ;;  %v492_v28 = vadd.s32 %v4681_v12, %v356_v5  ;;  %v1378_v47 = vld [vmem:[%s4651_s7 + $0x750] sm:$0x3]  ;;  %v364_v5 = vadd.s32 12928, %v4677_v9  ;;  %v5416_v19 = vld.sshfl [vmem:[#allocation1 + $0x30] sm:$0xff pattern:$0x73625140] }
  0xf0   : > { %4298 = vmatmul.msk.f32.vlgmr.msra.gmra.mxu3 %vm625_vm11, %v5255_v51  ;;  %4296 = vmatmul.msk.f32.vlgmr.msra.gmra.mxu1 %vm623_vm12, %v5260_v0  ;;  %v361_v51 = vadd.s32 12544, %v4677_v9  ;;  %v359_v0 = vadd.s32 12288, %v4677_v9  ;;  %vm631_vm4 = vcmp.lt.s32.totalorder %v496_v10, 69080  ;;  %v257_v36 = vld [vmem:[%s4665_s10 + $0xf0] sm:$0xff] }
  0xf1   : > { %v1932_v59 = vadd.f32 %v1931_v21, %v1912_v41  ;;  %3309 = vmatpush.xpose.msrb.mxu2 %v1238_v1  ;;  %3269 = vmatpush.xpose.msrb.mxu0 %v1236_v31  ;;  %vm627_vm0 = vcmp.lt.s32.totalorder %v492_v28, 69080  ;;  %v1246_v1 = vld [vmem:[%s4651_s7 + $0x330] sm:$0xff]  ;;  %v1244_v41 = vld [vmem:[%s4651_s7 + $0x320] sm:$0xff] }
  0xf2   : > { %v1951_v53 = vpop.f32.mrf.mxu2  ;;  %3329 = vmatpush.xpose.msrb.mxu3 %v1239_v55  ;;  %3289 = vmatpush.xpose.msrb.mxu1 %v1237_v8  ;;  %v497_v34 = vadd.s32 %v4681_v12, %v361_v51  ;;  %v495_v35 = vadd.s32 %v4681_v12, %v359_v0  ;;  %v501_v55 = vadd.s32 %v4681_v12, %v365_v23  ;;  %v5424_v8 = vld.sshfl [vmem:[#allocation1 + $0x28] sm:$0xff pattern:$0x73625140] }
  0xf3   : > { %v1952_v43 = vadd.f32 %v1951_v53, %v1932_v59  ;;  %v1971_v32 = vpop.f32.mrf.mxu3  ;;  %845 = vst [vmem:[#allocation1 + $0x20] ss:$4 sm:$0xff] %v256_v40  ;;  %v1385_v59 = vld [vmem:[%s4651_s7 + $0x788] sm:$0x3]  ;;  %v1384_v51 = vld [vmem:[%s4651_s7 + $0x780] sm:$0x3] }
  0xf4   : > { %v1991_v45 = vpop.f32.mrf.mxu0  ;;  %vm632_vm1 = vcmp.lt.s32.totalorder %v497_v34, 69080  ;;  %vm630_vm2 = vcmp.lt.s32.totalorder %v495_v35, 69080  ;;  %vm636_vm5 = vcmp.lt.s32.totalorder %v501_v55, 69080  ;;  %v5451_v34 = vld.sshfl [vmem:[#allocation1] sm:$0xff pattern:$0x73625140] }
  0xf5   : > { %3388 = vmatpush.xpose.msra.mxu2 %v1377_v13  ;;  %3348 = vmatpush.xpose.msra.mxu0 %v1375_v56  ;;  %v1972_v57 = vadd.f32 %v1971_v32, %v1952_v43  ;;  %v2011_v63 = vpop.f32.mrf.mxu1  ;;  %v1245_v56 = vld [vmem:[%s4651_s7 + $0x328] sm:$0xff]  ;;  %v5453_v35 = vld.sshfl [vmem:[#allocation1 + $0x18] sm:$0xff pattern:$0x73625140] }
  0xf6   : > { %3408 = vmatpush.xpose.msra.mxu3 %v1378_v47  ;;  %3368 = vmatpush.xpose.msra.mxu1 %v1376_v30  ;;  %v502_v47 = vadd.s32 %v4681_v12, %v366_v48  ;;  %v1383_v30 = vld [vmem:[%s4651_s7 + $0x778] sm:$0x3]  ;;  %v374_v48 = vadd.s32 14208, %v4677_v9 }
  0xf7   : > { %v1992_v14 = vadd.f32 %v1991_v45, %v1972_v57  ;;  %4301 = vmatmul.msk.f32.vlgmr.msrb.gmra.mxu2 %vm628_vm13, %v5284_v11  ;;  %4299 = vmatmul.msk.f32.vlgmr.msrb.gmra.mxu0 %vm626_vm14, %v5286_v20  ;;  %v1382_v11 = vld [vmem:[%s4651_s7 + $0x770] sm:$0x3]  ;;  %v1380_v20 = vld [vmem:[%s4651_s7 + $0x760] sm:$0x3] }
  0xf8   : > { %4302 = vmatmul.msk.f32.vlgmr.msrb.gmra.mxu3 %vm629_vm15, %v5288_v26  ;;  %4300 = vmatmul.msk.f32.vlgmr.msrb.gmra.mxu1 %vm627_vm0, %v5292_v27  ;;  %v363_v27 = vadd.s32 12800, %v4677_v9  ;;  %vm637_vm7 = vcmp.lt.s32.totalorder %v502_v47, 69080  ;;  %v5449_v57 = vld.sshfl [vmem:[#allocation1 + $0x10] sm:$0xff pattern:$0x73625140] }
  0xf9   : > { %v2012_v17 = vadd.f32 %v2011_v63, %v1992_v14  ;;  %3389 = vmatpush.xpose.msra.mxu2 %v1242_v39  ;;  %3349 = vmatpush.xpose.msra.mxu0 %v1240_v52  ;;  %v1250_v39 = vld [vmem:[%s4651_s7 + $0x350] sm:$0xff]  ;;  %v1255_v47 = vld [vmem:[%s4651_s7 + $0x378] sm:$0xff] }
  0xfa   : > { %v2031_v24 = vpop.f32.mrf.mxu2  ;;  %3409 = vmatpush.xpose.msra.mxu3 %v1243_v16  ;;  %3369 = vmatpush.xpose.msra.mxu1 %v1241_v3  ;;  %v499_v28 = vadd.s32 %v4681_v12, %v363_v27  ;;  %v5458_v3 = vld.sshfl [vmem:[#allocation1 + $0x8] sm:$0xff pattern:$0x73625140]  ;;  %v5484_v55 = vld.sshfl [vmem:[#allocation1 + $0x20] sm:$0xff pattern:$0x73625140] }
  0xfb   : > { %v2032_v25 = vadd.f32 %v2031_v24, %v2012_v17  ;;  %v2051_v26 = vpop.f32.mrf.mxu3  ;;  %v506_v17 = vadd.s32 %v4681_v12, %v370_v37  ;;  %854 = vst [vmem:[#allocation1] ss:$4 sm:$0xff] %v257_v36  ;;  %v1387_v24 = vld [vmem:[%s4651_s7 + $0x798] sm:$0x3]  ;;  %v378_v37 = vadd.s32 14720, %v4677_v9  ;;  %v1256_v36 = vld [vmem:[%s4651_s7 + $0x380] sm:$0xff] }
  0xfc   : > { %v2071_v4 = vpop.f32.mrf.mxu0  ;;  %vm634_vm6 = vcmp.lt.s32.totalorder %v499_v28, 69080  ;;  %v5486_v40 = vld.sshfl [vmem:[#allocation1 + $0x38] sm:$0xff pattern:$0x73625140] }
  0xfd   : > { %3468 = vmatpush.xpose.msrb.mxu2 %v1381_v18  ;;  %3428 = vmatpush.xpose.msrb.mxu0 %v1379_v42  ;;  %v2052_v21 = vadd.f32 %v2051_v26, %v2032_v25  ;;  %v2091_v31 = vpop.f32.mrf.mxu1  ;;  %v1251_v18 = vld [vmem:[%s4651_s7 + $0x358] sm:$0xff]  ;;  %v1249_v42 = vld [vmem:[%s4651_s7 + $0x348] sm:$0xff]  ;;  %v373_v26 = vadd.s32 14080, %v4677_v9  ;;  %vm641_vm11 = vcmp.lt.s32.totalorder %v506_v17, 69080  ;;  %v258_v28 = vld [vmem:[%s4665_s10 + $0xf8] sm:$0xff] }
  0xfe   : > { %3488 = vmatpush.xpose.msrb.mxu3 %v1382_v11  ;;  %3448 = vmatpush.xpose.msrb.mxu1 %v1380_v20  ;;  %v504_v11 = vadd.s32 %v4681_v12, %v368_v44  ;;  %v1389_v20 = vld [vmem:[%s4651_s7 + $0x7a8] sm:$0x3]  ;;  %v376_v44 = vadd.s32 14464, %v4677_v9 }
  0xff   : > { %v2072_v13 = vadd.f32 %v2071_v4, %v2052_v21  ;;  %4305 = vmatmul.msk.f32.vlgmr.msra.gmra.mxu2 %vm632_vm1, %v5317_v29  ;;  %4303 = vmatmul.msk.f32.vlgmr.msra.gmra.mxu0 %vm630_vm2, %v5319_v58  ;;  %v500_v29 = vadd.s32 %v4681_v12, %v364_v5  ;;  %v1386_v58 = vld [vmem:[%s4651_s7 + $0x790] sm:$0x3]  ;;  %v372_v5 = vadd.s32 13952, %v4677_v9  ;;  %v5482_v21 = vld.sshfl [vmem:[#allocation1 + $0x30] sm:$0xff pattern:$0x73625140] }
 0x100   : > { %4306 = vmatmul.msk.f32.vlgmr.msra.gmra.mxu3 %vm633_vm3, %v5321_v60  ;;  %4304 = vmatmul.msk.f32.vlgmr.msra.gmra.mxu1 %vm631_vm4, %v5326_v50  ;;  %v369_v60 = vadd.s32 13568, %v4677_v9  ;;  %v367_v50 = vadd.s32 13312, %v4677_v9  ;;  %vm639_vm12 = vcmp.lt.s32.totalorder %v504_v11, 69080  ;;  %v259_v17 = vld [vmem:[%s4665_s10 + $0x100] sm:$0xff] }
 0x101   : > { %v2092_v53 = vadd.f32 %v2091_v31, %v2072_v13  ;;  %3469 = vmatpush.xpose.msrb.mxu2 %v1246_v1  ;;  %3429 = vmatpush.xpose.msrb.mxu0 %v1244_v41  ;;  %vm635_vm8 = vcmp.lt.s32.totalorder %v500_v29, 69080  ;;  %v1254_v1 = vld [vmem:[%s4651_s7 + $0x370] sm:$0xff]  ;;  %v1252_v13 = vld [vmem:[%s4651_s7 + $0x360] sm:$0xff] }
 0x102   : > { %v2111_v0 = vpop.f32.mrf.mxu2  ;;  %3489 = vmatpush.xpose.msrb.mxu3 %v1247_v46  ;;  %3449 = vmatpush.xpose.msrb.mxu1 %v1245_v56  ;;  %v505_v14 = vadd.s32 %v4681_v12, %v369_v60  ;;  %v503_v16 = vadd.s32 %v4681_v12, %v367_v50  ;;  %v509_v46 = vadd.s32 %v4681_v12, %v373_v26  ;;  %v5490_v56 = vld.sshfl [vmem:[#allocation1 + $0x28] sm:$0xff pattern:$0x73625140] }
 0x103   : > { %v2112_v43 = vadd.f32 %v2111_v0, %v2092_v53  ;;  %v2131_v32 = vpop.f32.mrf.mxu3  ;;  %855 = vst [vmem:[#allocation1 + $0x20] ss:$4 sm:$0xff] %v258_v28  ;;  %v1393_v53 = vld [vmem:[%s4651_s7 + $0x7c8] sm:$0x3]  ;;  %v1392_v60 = vld [vmem:[%s4651_s7 + $0x7c0] sm:$0x3] }
 0x104   : > { %v2151_v45 = vpop.f32.mrf.mxu0  ;;  %vm640_vm9 = vcmp.lt.s32.totalorder %v505_v14, 69080  ;;  %vm638_vm10 = vcmp.lt.s32.totalorder %v503_v16, 69080  ;;  %vm644_vm13 = vcmp.lt.s32.totalorder %v509_v46, 69080  ;;  %v5517_v14 = vld.sshfl [vmem:[#allocation1] sm:$0xff pattern:$0x73625140] }
 0x105   : > { %3548 = vmatpush.xpose.msra.mxu2 %v1385_v59  ;;  %3508 = vmatpush.xpose.msra.mxu0 %v1383_v30  ;;  %v2132_v63 = vadd.f32 %v2131_v32, %v2112_v43  ;;  %v2171_v52 = vpop.f32.mrf.mxu1  ;;  %v1253_v30 = vld [vmem:[%s4651_s7 + $0x368] sm:$0xff]  ;;  %v5519_v16 = vld.sshfl [vmem:[#allocation1 + $0x18] sm:$0xff pattern:$0x73625140] }
 0x106   : > { %3568 = vmatpush.xpose.msra.mxu3 %v1386_v58  ;;  %3528 = vmatpush.xpose.msra.mxu1 %v1384_v51  ;;  %v510_v58 = vadd.s32 %v4681_v12, %v374_v48  ;;  %v1391_v51 = vld [vmem:[%s4651_s7 + $0x7b8] sm:$0x3]  ;;  %v382_v48 = vadd.s32 15232, %v4677_v9 }
 0x107   : > { %v2152_v10 = vadd.f32 %v2151_v45, %v2132_v63  ;;  %4309 = vmatmul.msk.f32.vlgmr.msrb.gmra.mxu2 %vm636_vm5, %v5350_v15  ;;  %4307 = vmatmul.msk.f32.vlgmr.msrb.gmra.mxu0 %vm634_vm6, %v5352_v22  ;;  %v1390_v15 = vld [vmem:[%s4651_s7 + $0x7b0] sm:$0x3]  ;;  %v1388_v22 = vld [vmem:[%s4651_s7 + $0x7a0] sm:$0x3] }
 0x108   : > { %4310 = vmatmul.msk.f32.vlgmr.msrb.gmra.mxu3 %vm637_vm7, %v5354_v6  ;;  %4308 = vmatmul.msk.f32.vlgmr.msrb.gmra.mxu1 %vm635_vm8, %v5358_v38  ;;  %v371_v38 = vadd.s32 13824, %v4677_v9  ;;  %vm645_vm15 = vcmp.lt.s32.totalorder %v510_v58, 69080  ;;  %v5515_v63 = vld.sshfl [vmem:[#allocation1 + $0x10] sm:$0xff pattern:$0x73625140] }
 0x109   : > { %v2172_v23 = vadd.f32 %v2171_v52, %v2152_v10  ;;  %3549 = vmatpush.xpose.msra.mxu2 %v1250_v39  ;;  %3509 = vmatpush.xpose.msra.mxu0 %v1248_v62  ;;  %v1258_v39 = vld [vmem:[%s4651_s7 + $0x390] sm:$0xff]  ;;  %v1261_v58 = vld [vmem:[%s4651_s7 + $0x3a8] sm:$0xff] }
 0x10a   : > { %v2191_v25 = vpop.f32.mrf.mxu2  ;;  %3569 = vmatpush.xpose.msra.mxu3 %v1251_v18  ;;  %3529 = vmatpush.xpose.msra.mxu1 %v1249_v42  ;;  %v507_v29 = vadd.s32 %v4681_v12, %v371_v38  ;;  %v5524_v42 = vld.sshfl [vmem:[#allocation1 + $0x8] sm:$0xff pattern:$0x73625140]  ;;  %v5550_v46 = vld.sshfl [vmem:[#allocation1 + $0x20] sm:$0xff pattern:$0x73625140] }
 0x10b   : > { %v2192_v27 = vadd.f32 %v2191_v25, %v2172_v23  ;;  %v2211_v6 = vpop.f32.mrf.mxu3  ;;  %v514_v23 = vadd.s32 %v4681_v12, %v378_v37  ;;  %864 = vst [vmem:[#allocation1] ss:$4 sm:$0xff] %v259_v17  ;;  %v1395_v25 = vld [vmem:[%s4651_s7 + $0x7d8] sm:$0x3]  ;;  %v383_v37 = vadd.s32 15360, %v4677_v9  ;;  %v1265_v17 = vld [vmem:[%s4651_s7 + $0x3c8] sm:$0xff] }
 0x10c   : > { %v2231_v4 = vpop.f32.mrf.mxu0  ;;  %vm642_vm14 = vcmp.lt.s32.totalorder %v507_v29, 69080  ;;  %v5552_v28 = vld.sshfl [vmem:[#allocation1 + $0x38] sm:$0xff pattern:$0x73625140] }
 0x10d   : > { %3628 = vmatpush.xpose.msrb.mxu2 %v1389_v20  ;;  %3588 = vmatpush.xpose.msrb.mxu0 %v1387_v24  ;;  %v2212_v31 = vadd.f32 %v2211_v6, %v2192_v27  ;;  %v2251_v41 = vpop.f32.mrf.mxu1  ;;  %v1259_v20 = vld [vmem:[%s4651_s7 + $0x398] sm:$0xff]  ;;  %v1257_v24 = vld [vmem:[%s4651_s7 + $0x388] sm:$0xff]  ;;  %vm649_vm3 = vcmp.lt.s32.totalorder %v514_v23, 69080 }
 0x10e   : > { %3648 = vmatpush.xpose.msrb.mxu3 %v1390_v15  ;;  %3608 = vmatpush.xpose.msrb.mxu1 %v1388_v22  ;;  %v512_v15 = vadd.s32 %v4681_v12, %v376_v44  ;;  %v1397_v22 = vld [vmem:[%s4651_s7 + $0x7e8] sm:$0x3]  ;;  %v1403_v23 = vld [vmem:[%s4651_s7 + $0x818] sm:$0x3] }
 0x10f   : > { %v2232_v59 = vadd.f32 %v2231_v4, %v2212_v31  ;;  %4313 = vmatmul.msk.f32.vlgmr.msra.gmra.mxu2 %vm640_vm9, %v5383_v33  ;;  %4311 = vmatmul.msk.f32.vlgmr.msra.gmra.mxu0 %vm638_vm10, %v5385_v49  ;;  %v508_v33 = vadd.s32 %v4681_v12, %v372_v5  ;;  %v1394_v49 = vld [vmem:[%s4651_s7 + $0x7d0] sm:$0x3]  ;;  %v380_v5 = vadd.s32 14976, %v4677_v9  ;;  %v5548_v31 = vld.sshfl [vmem:[#allocation1 + $0x30] sm:$0xff pattern:$0x73625140] }
 0x110   : > { %4314 = vmatmul.msk.f32.vlgmr.msra.gmra.mxu3 %vm641_vm11, %v5387_v2  ;;  %4312 = vmatmul.msk.f32.vlgmr.msra.gmra.mxu1 %vm639_vm12, %v5392_v61  ;;  %v377_v2 = vadd.s32 14592, %v4677_v9  ;;  %v375_v61 = vadd.s32 14336, %v4677_v9  ;;  %vm647_vm4 = vcmp.lt.s32.totalorder %v512_v15, 69080  ;;  %v1262_v4 = vld [vmem:[%s4651_s7 + $0x3b0] sm:$0xff] }
 0x111   : > { %v2252_v0 = vadd.f32 %v2251_v41, %v2232_v59  ;;  %3629 = vmatpush.xpose.msrb.mxu2 %v1254_v1  ;;  %3589 = vmatpush.xpose.msrb.mxu0 %v1252_v13  ;;  %vm643_vm0 = vcmp.lt.s32.totalorder %v508_v33, 69080  ;;  %v379_v1 = vadd.s32 14848, %v4677_v9  ;;  %v1260_v59 = vld [vmem:[%s4651_s7 + $0x3a0] sm:$0xff]  ;;  %v1401_v33 = vld [vmem:[%s4651_s7 + $0x808] sm:$0x3] }
 0x112   : > { %v2271_v50 = vpop.f32.mrf.mxu2  ;;  %3649 = vmatpush.xpose.msrb.mxu3 %v1255_v47  ;;  %3609 = vmatpush.xpose.msrb.mxu1 %v1253_v30  ;;  %v513_v10 = vadd.s32 %v4681_v12, %v377_v2  ;;  %v511_v18 = vadd.s32 %v4681_v12, %v375_v61  ;;  %v5555_v47 = vld.sshfl [vmem:[#allocation1 + $0x28] sm:$0xff pattern:$0x73625140] }
 0x113   : > { %v2272_v43 = vadd.f32 %v2271_v50, %v2252_v0  ;;  %v2291_v32 = vpop.f32.mrf.mxu3  ;;  %v260_v30 = vld [vmem:[%s4665_s10 + $0x108] sm:$0x3f]  ;;  %v515_v0 = vadd.s32 %v4681_v12, %v379_v1  ;;  %v516_v50 = vadd.s32 %v4681_v12, %v380_v5  ;;  %v1271_v5 = vld [vmem:[%s4651_s7 + $0x3f8] sm:$0xff] }
 0x114   : > { %v2311_v45 = vpop.f32.mrf.mxu0  ;;  %vm648_vm1 = vcmp.lt.s32.totalorder %v513_v10, 69080  ;;  %vm646_vm2 = vcmp.lt.s32.totalorder %v511_v18, 69080  ;;  %865 = vst [vmem:[#allocation1 + $0x20] ss:$4 sm:$0xff] %v260_v30  ;;  %v1400_v2 = vld [vmem:[%s4651_s7 + $0x800] sm:$0x3] }
 0x115   : > { %3708 = vmatpush.xpose.msra.mxu2 %v1393_v53  ;;  %3668 = vmatpush.xpose.msra.mxu0 %v1391_v51  ;;  %v2292_v52 = vadd.f32 %v2291_v32, %v2272_v43  ;;  %v2331_v62 = vpop.f32.mrf.mxu1  ;;  %v1263_v53 = vld [vmem:[%s4651_s7 + $0x3b8] sm:$0xff]  ;;  %v385_v43 = vadd.s32 15616, %v4677_v9  ;;  %vm650_vm6 = vcmp.lt.s32.totalorder %v515_v0, 69080  ;;  %vm651_vm8 = vcmp.lt.s32.totalorder %v516_v50, 69080  ;;  %v1268_v1 = vld [vmem:[%s4651_s7 + $0x3e0] sm:$0xff] }
 0x116   : > { %3728 = vmatpush.xpose.msra.mxu3 %v1394_v49  ;;  %3688 = vmatpush.xpose.msra.mxu1 %v1392_v60  ;;  %v1399_v49 = vld [vmem:[%s4651_s7 + $0x7f8] sm:$0x3]  ;;  %v393_v0 = vadd.s32 16640, %v4677_v9  ;;  %v394_v50 = vadd.s32 16768, %v4677_v9 }
 0x117   : > { %v2312_v11 = vadd.f32 %v2311_v45, %v2292_v52  ;;  %4317 = vmatmul.msk.f32.vlgmr.msrb.gmra.mxu2 %vm644_vm13, %v5416_v19  ;;  %4315 = vmatmul.msk.f32.vlgmr.msrb.gmra.mxu0 %vm642_vm14, %v5418_v7  ;;  %v1398_v19 = vld [vmem:[%s4651_s7 + $0x7f0] sm:$0x3]  ;;  %v1396_v7 = vld [vmem:[%s4651_s7 + $0x7e0] sm:$0x3]  ;;  %v384_v52 = vadd.s32 15488, %v4677_v9  ;;  %v1267_v18 = vld [vmem:[%s4651_s7 + $0x3d8] sm:$0xff] }
 0x118   : > { %4318 = vmatmul.msk.f32.vlgmr.msrb.gmra.mxu3 %vm645_vm15, %v5420_v54  ;;  %4316 = vmatmul.msk.f32.vlgmr.msrb.gmra.mxu1 %vm643_vm0, %v5424_v8  ;;  %v381_v54 = vadd.s32 15104, %v4677_v9 }
 0x119   : > { %v2332_v26 = vadd.f32 %v2331_v62, %v2312_v11  ;;  %3709 = vmatpush.xpose.msra.mxu2 %v1258_v39  ;;  %3669 = vmatpush.xpose.msra.mxu0 %v1256_v36  ;;  %v386_v39 = vadd.s32 15744, %v4677_v9  ;;  %v1266_v62 = vld [vmem:[%s4651_s7 + $0x3d0] sm:$0xff]  ;;  %v1264_v36 = vld [vmem:[%s4651_s7 + $0x3c0] sm:$0xff]  ;;  %v521_v11 = vadd.s32 %v4681_v12, %v385_v43  ;;  %v1275_v43 = vld [vmem:[%s4651_s7 + $0x418] sm:$0xff] }
 0x11a   : > { %v2351_v27 = vpop.f32.mrf.mxu2  ;;  %3729 = vmatpush.xpose.msra.mxu3 %v1259_v20  ;;  %3689 = vmatpush.xpose.msra.mxu1 %v1257_v24  ;;  %v517_v51 = vadd.s32 %v4681_v12, %v381_v54  ;;  %v1405_v20 = vld [vmem:[%s4651_s7 + $0x828] sm:$0x3]  ;;  %v519_v24 = vadd.s32 %v4681_v12, %v383_v37  ;;  %v529_v37 = vadd.s32 %v4681_v12, %v393_v0 }
 0x11b   : > { %v2352_v6 = vadd.f32 %v2351_v27, %v2332_v26  ;;  %v2371_v38 = vpop.f32.mrf.mxu3  ;;  %vm656_vm9 = vcmp.lt.s32.totalorder %v521_v11, 69080  ;;  %v387_v27 = vadd.s32 15872, %v4677_v9  ;;  %v869_v11 = vld.sshfl [vmem:[#allocation1 + $0x18] sm:$0xff pattern:$0x73625140] }
 0x11c   : > { %v2391_v8 = vpop.f32.mrf.mxu0  ;;  %vm652_vm5 = vcmp.lt.s32.totalorder %v517_v51, 69080  ;;  %vm654_vm10 = vcmp.lt.s32.totalorder %v519_v24, 69080  ;;  %v1408_v51 = vld [vmem:[%s4651_s7 + $0x840] sm:$0x3]  ;;  %v395_v24 = vadd.s32 16896, %v4677_v9 }
 0x11d   : > { %3788 = vmatpush.xpose.msrb.mxu2 %v1397_v22  ;;  %3748 = vmatpush.xpose.msrb.mxu0 %v1395_v25  ;;  %v2372_v41 = vadd.f32 %v2371_v38, %v2352_v6  ;;  %v2411_v13 = vpop.f32.mrf.mxu1  ;;  %v1406_v22 = vld [vmem:[%s4651_s7 + $0x830] sm:$0x3]  ;;  %v1404_v25 = vld [vmem:[%s4651_s7 + $0x820] sm:$0x3]  ;;  %v390_v6 = vadd.s32 16256, %v4677_v9  ;;  %v523_v30 = vadd.s32 %v4681_v12, %v387_v27 }
 0x11e   : > { %3808 = vmatpush.xpose.msrb.mxu3 %v1398_v19  ;;  %3768 = vmatpush.xpose.msrb.mxu1 %v1396_v7  ;;  %v389_v7 = vadd.s32 16128, %v4677_v9 }
 0x11f   : > { %v2392_v29 = vadd.f32 %v2391_v8, %v2372_v41  ;;  %4321 = vmatmul.msk.f32.vlgmr.msra.gmra.mxu2 %vm648_vm1, %v5449_v57  ;;  %4319 = vmatmul.msk.f32.vlgmr.msra.gmra.mxu0 %vm646_vm2, %v5451_v34  ;;  %v518_v57 = vadd.s32 %v4681_v12, %v382_v48  ;;  %v1402_v34 = vld [vmem:[%s4651_s7 + $0x810] sm:$0x3]  ;;  %v388_v8 = vadd.s32 16000, %v4677_v9  ;;  %v1269_v41 = vld [vmem:[%s4651_s7 + $0x3e8] sm:$0xff]  ;;  %vm658_vm14 = vcmp.lt.s32.totalorder %v523_v30, 69080 }
 0x120   : > { %4322 = vmatmul.msk.f32.vlgmr.msra.gmra.mxu3 %vm649_vm3, %v5453_v35  ;;  %4320 = vmatmul.msk.f32.vlgmr.msra.gmra.mxu1 %vm647_vm4, %v5458_v3  ;;  %vm664_vm1 = vcmp.lt.s32.totalorder %v529_v37, 69080 }
 0x121   : > { %v2412_v60 = vadd.f32 %v2411_v13, %v2392_v29  ;;  %3789 = vmatpush.xpose.msrb.mxu2 %v1262_v4  ;;  %3749 = vmatpush.xpose.msrb.mxu0 %v1260_v59  ;;  %vm653_vm7 = vcmp.lt.s32.totalorder %v518_v57, 69080  ;;  %v1270_v4 = vld [vmem:[%s4651_s7 + $0x3f0] sm:$0xff]  ;;  %v525_v13 = vadd.s32 %v4681_v12, %v389_v7  ;;  %v1409_v59 = vld [vmem:[%s4651_s7 + $0x848] sm:$0x3]  ;;  %v526_v29 = vadd.s32 %v4681_v12, %v390_v6 }
 0x122   : > { %v2431_v61 = vpop.f32.mrf.mxu2  ;;  %3809 = vmatpush.xpose.msrb.mxu3 %v1263_v53  ;;  %3769 = vmatpush.xpose.msrb.mxu1 %v1261_v58  ;;  %v1407_v53 = vld [vmem:[%s4651_s7 + $0x838] sm:$0x3] }
 0x123   : > { %v2432_v35 = vadd.f32 %v2431_v61, %v2412_v60  ;;  %v2451_v3 = vpop.f32.mrf.mxu3  ;;  %vm660_vm13 = vcmp.lt.s32.totalorder %v525_v13, 69080  ;;  %vm661_vm15 = vcmp.lt.s32.totalorder %v526_v29, 69080  ;;  %v1274_v61 = vld [vmem:[%s4651_s7 + $0x410] sm:$0xff] }
 0x124   : > { %v2471_v32 = vpop.f32.mrf.mxu0 }
 0x125   : > { %3868 = vmatpush.xpose.msra.mxu2 %v1401_v33  ;;  %3828 = vmatpush.xpose.msra.mxu0 %v1399_v49  ;;  %v2452_v44 = vadd.f32 %v2451_v3, %v2432_v35  ;;  %v2491_v45 = vpop.f32.mrf.mxu1  ;;  %v391_v49 = vadd.s32 16384, %v4677_v9  ;;  %v1272_v35 = vld [vmem:[%s4651_s7 + $0x400] sm:$0xff] }
 0x126   : > { %3888 = vmatpush.xpose.msra.mxu3 %v1402_v34  ;;  %3848 = vmatpush.xpose.msra.mxu1 %v1400_v2  ;;  %v392_v2 = vadd.s32 16512, %v4677_v9 }
 0x127   : > { %v2472_v10 = vadd.f32 %v2471_v32, %v2452_v44  ;;  %4325 = vmatmul.msk.f32.vlgmr.msrb.gmra.mxu2 %vm652_vm5, %v5482_v21  ;;  %4323 = vmatmul.msk.f32.vlgmr.msrb.gmra.mxu0 %vm650_vm6, %v5484_v55  ;;  %v522_v21 = vadd.s32 %v4681_v12, %v386_v39  ;;  %v520_v55 = vadd.s32 %v4681_v12, %v384_v52  ;;  %v1273_v32 = vld [vmem:[%s4651_s7 + $0x408] sm:$0xff]  ;;  %v1411_v39 = vld [vmem:[%s4651_s7 + $0x858] sm:$0x3] }
 0x128   : > { %4326 = vmatmul.msk.f32.vlgmr.msrb.gmra.mxu3 %vm653_vm7, %v5486_v40  ;;  %4324 = vmatmul.msk.f32.vlgmr.msrb.gmra.mxu1 %vm651_vm8, %v5490_v56  ;;  %v1413_v44 = vld [vmem:[%s4651_s7 + $0x868] sm:$0x3]  ;;  %vm4115_vm8 = vcmask 74752  }
 0x129   : > { %v2492_v15 = vadd.f32 %v2491_v45, %v2472_v10  ;;  %3869 = vmatpush.xpose.msra.mxu2 %v1266_v62  ;;  %3829 = vmatpush.xpose.msra.mxu0 %v1264_v36  ;;  %vm657_vm11 = vcmp.lt.s32.totalorder %v522_v21, 69080  ;;  %vm655_vm12 = vcmp.lt.s32.totalorder %v520_v55, 69080  ;;  %v527_v45 = vadd.s32 %v4681_v12, %v391_v49  ;;  %v1412_v62 = vld [vmem:[%s4651_s7 + $0x860] sm:$0x3]  ;;  %v1278_v55 = vld [vmem:[%s4651_s7 + $0x430] sm:$0xff] }
 0x12a   : > { %v2511_v26 = vpop.f32.mrf.mxu2  ;;  %3889 = vmatpush.xpose.msra.mxu3 %v1267_v18  ;;  %3849 = vmatpush.xpose.msra.mxu1 %v1265_v17  ;;  %v868_v10 = vld.sshfl [vmem:[#allocation1 + $0x10] sm:$0xff pattern:$0x73625140]  ;;  %v867_v21 = vld.sshfl [vmem:[#allocation1 + $0x8] sm:$0xff pattern:$0x73625140] }
 0x12b   : > { %v2512_v19 = vadd.f32 %v2511_v26, %v2492_v15  ;;  %v2531_v40 = vpop.f32.mrf.mxu3  ;;  %vm662_vm2 = vcmp.lt.s32.totalorder %v527_v45, 69080 }
 0x12c   : > { %v2551_v56 = vpop.f32.mrf.mxu0 }
 0x12d   : > { %3948 = vmatpush.xpose.msrb.mxu2 %v1405_v20  ;;  %3908 = vmatpush.xpose.msrb.mxu0 %v1403_v23  ;;  %v2532_v38 = vadd.f32 %v2531_v40, %v2512_v19  ;;  %v2571_v54 = vpop.f32.mrf.mxu1  ;;  %v397_v20 = vadd.s32 17152, %v4677_v9  ;;  %v1277_v19 = vld [vmem:[%s4651_s7 + $0x428] sm:$0xff] }
 0x12e   : > { %3968 = vmatpush.xpose.msrb.mxu3 %v1406_v22  ;;  %3928 = vmatpush.xpose.msrb.mxu1 %v1404_v25  ;;  %v396_v22 = vadd.s32 17024, %v4677_v9  ;;  %v1276_v25 = vld [vmem:[%s4651_s7 + $0x420] sm:$0xff] }
 0x12f   : > { %v2552_v48 = vadd.f32 %v2551_v56, %v2532_v38  ;;  %4329 = vmatmul.msk.f32.vlgmr.msra.gmra.mxu2 %vm656_vm9, %v5515_v63  ;;  %4327 = vmatmul.msk.f32.vlgmr.msra.gmra.mxu0 %vm654_vm10, %v5517_v14  ;;  %v1410_v63 = vld [vmem:[%s4651_s7 + $0x850] sm:$0x3]  ;;  %v524_v14 = vadd.s32 %v4681_v12, %v388_v8  ;;  %v533_v40 = vadd.s32 %v4681_v12, %v397_v20 }
 0x130   : > { %4330 = vmatmul.msk.f32.vlgmr.msra.gmra.mxu3 %vm657_vm11, %v5519_v16  ;;  %4328 = vmatmul.msk.f32.vlgmr.msra.gmra.mxu1 %vm655_vm12, %v5524_v42  ;;  %v531_v56 = vadd.s32 %v4681_v12, %v395_v24  ;;  %v532_v27 = vadd.s32 %v4681_v12, %v396_v22 }
 0x131   : > { %v2572_v58 = vadd.f32 %v2571_v54, %v2552_v48  ;;  %3949 = vmatpush.xpose.msrb.mxu2 %v1270_v4  ;;  %3909 = vmatpush.xpose.msrb.mxu0 %v1268_v1  ;;  %vm659_vm0 = vcmp.lt.s32.totalorder %v524_v14, 69080  ;;  %v872_v54 = vld.sshfl [vmem:[#allocation1 + $0x30] sm:$0xff pattern:$0x73625140]  ;;  %vm668_vm5 = vcmp.lt.s32.totalorder %v533_v40, 69080 }
 0x132   : > { %v2591_v33 = vpop.f32.mrf.mxu2  ;;  %3969 = vmatpush.xpose.msrb.mxu3 %v1271_v5  ;;  %3929 = vmatpush.xpose.msrb.mxu1 %v1269_v41  ;;  %vm666_vm6 = vcmp.lt.s32.totalorder %v531_v56, 69080  ;;  %v870_v4 = vld.sshfl [vmem:[#allocation1 + $0x20] sm:$0xff pattern:$0x73625140]  ;;  %vm667_vm7 = vcmp.lt.s32.totalorder %v532_v27, 69080 }
 0x133   : > { %v2592_v16 = vadd.f32 %v2591_v33, %v2572_v58  ;;  %v2611_v42 = vpop.f32.mrf.mxu3  ;;  %v871_v5 = vld.sshfl [vmem:[#allocation1 + $0x28] sm:$0xff pattern:$0x73625140] }
 0x134   : > { %v2631_v57 = vpop.f32.mrf.mxu0 }
 0x135   : > { %4028 = vmatpush.xpose.msra.mxu2 %v1409_v59  ;;  %3988 = vmatpush.xpose.msra.mxu0 %v1407_v53  ;;  %v2612_v60 = vadd.f32 %v2611_v42, %v2592_v16  ;;  %v2651_v34 = vpop.f32.mrf.mxu1 }
 0x136   : > { %4048 = vmatpush.xpose.msra.mxu3 %v1410_v63  ;;  %4008 = vmatpush.xpose.msra.mxu1 %v1408_v51 }
 0x137   : > { %v2632_v3 = vadd.f32 %v2631_v57, %v2612_v60  ;;  %4333 = vmatmul.msk.f32.vlgmr.msrb.gmra.mxu2 %vm660_vm13, %v5548_v31  ;;  %4331 = vmatmul.msk.f32.vlgmr.msrb.gmra.mxu0 %vm658_vm14, %v5550_v46  ;;  %v530_v31 = vadd.s32 %v4681_v12, %v394_v50  ;;  %v528_v46 = vadd.s32 %v4681_v12, %v392_v2 }
 0x138   : > { %4334 = vmatmul.msk.f32.vlgmr.msrb.gmra.mxu3 %vm661_vm15, %v5552_v28  ;;  %4332 = vmatmul.msk.f32.vlgmr.msrb.gmra.mxu1 %vm659_vm0, %v5555_v47  ;;  %v866_v47 = vld.sshfl [vmem:[#allocation1] sm:$0xff pattern:$0x73625140] }
 0x139   : > { %v2652_v52 = vadd.f32 %v2651_v34, %v2632_v3  ;;  %4029 = vmatpush.xpose.msra.mxu2 %v1274_v61  ;;  %3989 = vmatpush.xpose.msra.mxu0 %v1272_v35  ;;  %vm665_vm3 = vcmp.lt.s32.totalorder %v530_v31, 69080  ;;  %vm663_vm4 = vcmp.lt.s32.totalorder %v528_v46, 69080 }
 0x13a   : > { %v2671_v36 = vpop.f32.mrf.mxu2  ;;  %4049 = vmatpush.xpose.msra.mxu3 %v1275_v43  ;;  %4009 = vmatpush.xpose.msra.mxu1 %v1273_v32 }
 0x13b   : > { %v2672_v18 = vadd.f32 %v2671_v36, %v2652_v52  ;;  %v2691_v28 = vpop.f32.mrf.mxu3 }
 0x13c   : > { %v2711_v17 = vpop.f32.mrf.mxu0 }
 0x13d   : > { %4108 = vmatpush.xpose.msrb.mxu2 %v1413_v44  ;;  %4068 = vmatpush.xpose.msrb.mxu0 %v1411_v39  ;;  %v2692_v23 = vadd.f32 %v2691_v28, %v2672_v18  ;;  %v2731_v15 = vpop.f32.mrf.mxu1 }
 0x13e   : > { %4088 = vmatpush.xpose.msrb.mxu1 %v1412_v62 }
 0x13f   : > { %v2712_v26 = vadd.f32 %v2711_v17, %v2692_v23  ;;  %4337 = vmatmul.msk.f32.vlgmr.msra.gmra.mxu2 %vm664_vm1, %v868_v10  ;;  %4335 = vmatmul.msk.f32.vlgmr.msra.gmra.mxu0 %vm662_vm2, %v866_v47 }
 0x140   : > { %4338 = vmatmul.msk.f32.vlgmr.msra.gmra.mxu3 %vm665_vm3, %v869_v11  ;;  %4336 = vmatmul.msk.f32.vlgmr.msra.gmra.mxu1 %vm663_vm4, %v867_v21 }
 0x141   : > { %v2732_v7 = vadd.f32 %v2731_v15, %v2712_v26  ;;  %4109 = vmatpush.xpose.msrb.mxu2 %v1278_v55  ;;  %4069 = vmatpush.xpose.msrb.mxu0 %v1276_v25 }
 0x142   : > { %v2751_v6 = vpop.f32.mrf.mxu2  ;;  %4089 = vmatpush.xpose.msrb.mxu1 %v1277_v19 }
 0x143   : > { %v2752_v9 = vadd.f32 %v2751_v6, %v2732_v7  ;;  %v2771_v38 = vpop.f32.mrf.mxu3 }
 0x144   : > { %v2791_v8 = vpop.f32.mrf.mxu0 }
 0x145   : > { %v2772_v1 = vadd.f32 %v2771_v38, %v2752_v9  ;;  %v2811_v48 = vpop.f32.mrf.mxu1 }
 0x147   : > { %v2792_v41 = vadd.f32 %v2791_v8, %v2772_v1  ;;  %4341 = vmatmul.msk.f32.vlgmr.msrb.gmra.mxu2 %vm668_vm5, %v872_v54  ;;  %4339 = vmatmul.msk.f32.vlgmr.msrb.gmra.mxu0 %vm666_vm6, %v870_v4 }
 0x148   : > { %4340 = vmatmul.msk.f32.vlgmr.msrb.gmra.mxu1 %vm667_vm7, %v871_v5 }
 0x149   : > { %v2812_v13 = vadd.f32 %v2811_v48, %v2792_v41 }
 0x14a   : > { %v2831_v59 = vpop.f32.mrf.mxu2 }
 0x14b   : > { %v2832_v12 = vadd.f32 %v2831_v59, %v2812_v13  ;;  %v2851_v30 = vpop.f32.mrf.mxu3 }
 0x14c   : > { %v2871_v29 = vpop.f32.mrf.mxu0 }
 0x14d   : > { %v2852_v53 = vadd.f32 %v2851_v30, %v2832_v12  ;;  %v2891_v58 = vpop.f32.mrf.mxu1 }
 0x14f   : > { %v2872_v63 = vadd.f32 %v2871_v29, %v2852_v53 }
 0x151   : > { %v2892_v14 = vadd.f32 %v2891_v58, %v2872_v63 }
 0x152   : > { %v2911_v51 = vpop.f32.mrf.mxu2 }
 0x153   : > { %v2912_v33 = vadd.f32 %v2911_v51, %v2892_v14  ;;  %v2931_v16 = vpop.f32.mrf.mxu3 }
 0x154   : > { %v2951_v42 = vpop.f32.mrf.mxu0 }
 0x155   : > { %v2932_v0 = vadd.f32 %v2931_v16, %v2912_v33  ;;  %v2971_v57 = vpop.f32.mrf.mxu1 }
 0x157   : > { %v2952_v49 = vadd.f32 %v2951_v42, %v2932_v0 }
 0x159   : > { %v2972_v60 = vadd.f32 %v2971_v57, %v2952_v49 }
 0x15a   : > { %v2991_v34 = vpop.f32.mrf.mxu2 }
 0x15b   : > { %v2992_v50 = vadd.f32 %v2991_v34, %v2972_v60  ;;  %v3011_v2 = vpop.f32.mrf.mxu3 }
 0x15c   : > { %v3031_v61 = vpop.f32.mrf.mxu0 }
 0x15d   : > { %v3012_v35 = vadd.f32 %v3011_v2, %v2992_v50  ;;  %v3051_v3 = vpop.f32.mrf.mxu1 }
 0x15f   : > { %v3032_v43 = vadd.f32 %v3031_v61, %v3012_v35 }
 0x161   : > { %v3052_v32 = vadd.f32 %v3051_v3, %v3032_v43 }
 0x162   : > { %v3071_v37 = vpop.f32.mrf.mxu2 }
 0x163   : > { %v3072_v44 = vadd.f32 %v3071_v37, %v3052_v32  ;;  %v3091_v45 = vpop.f32.mrf.mxu3 }
 0x164   : > { %v3111_v39 = vpop.f32.mrf.mxu0 }
 0x165   : > { %v3092_v52 = vadd.f32 %v3091_v45, %v3072_v44  ;;  %v3131_v31 = vpop.f32.mrf.mxu1 }
 0x167   : > { %v3112_v46 = vadd.f32 %v3111_v39, %v3092_v52 }
 0x169   : > { %v3132_v62 = vadd.f32 %v3131_v31, %v3112_v46 }
 0x16a   : > { %v3151_v36 = vpop.f32.mrf.mxu2 }
 0x16b   : > { %v3152_v10 = vadd.f32 %v3151_v36, %v3132_v62  ;;  %v3171_v18 = vpop.f32.mrf.mxu3 }
 0x16c   : > { %v3191_v28 = vpop.f32.mrf.mxu0 }
 0x16d   : > { %v3172_v47 = vadd.f32 %v3171_v18, %v3152_v10  ;;  %v3211_v17 = vpop.f32.mrf.mxu1 }
 0x16f   : > { %v3192_v11 = vadd.f32 %v3191_v28, %v3172_v47 }
 0x171   : > { %v3212_v20 = vadd.f32 %v3211_v17, %v3192_v11 }
 0x172   : > { %v3231_v24 = vpop.f32.mrf.mxu2 }
 0x173   : > { %v3232_v23 = vadd.f32 %v3231_v24, %v3212_v20  ;;  %v3251_v15 = vpop.f32.mrf.mxu3 }
 0x174   : > { %v3271_v21 = vpop.f32.mrf.mxu0 }
 0x175   : > { %v3252_v22 = vadd.f32 %v3251_v15, %v3232_v23  ;;  %v3291_v55 = vpop.f32.mrf.mxu1 }
 0x177   : > { %v3272_v25 = vadd.f32 %v3271_v21, %v3252_v22 }
 0x179   : > { %v3292_v26 = vadd.f32 %v3291_v55, %v3272_v25 }
 0x17a   : > { %v3311_v19 = vpop.f32.mrf.mxu2 }
 0x17b   : > { %v3312_v40 = vadd.f32 %v3311_v19, %v3292_v26  ;;  %v3331_v56 = vpop.f32.mrf.mxu3 }
 0x17c   : > { %v3351_v7 = vpop.f32.mrf.mxu0 }
 0x17d   : > { %v3332_v27 = vadd.f32 %v3331_v56, %v3312_v40  ;;  %v3371_v6 = vpop.f32.mrf.mxu1 }
 0x17f   : > { %v3352_v9 = vadd.f32 %v3351_v7, %v3332_v27 }
 0x181   : > { %v3372_v38 = vadd.f32 %v3371_v6, %v3352_v9 }
 0x182   : > { %v3391_v54 = vpop.f32.mrf.mxu2 }
 0x183   : > { %v3392_v8 = vadd.f32 %v3391_v54, %v3372_v38  ;;  %v3411_v4 = vpop.f32.mrf.mxu3 }
 0x184   : > { %v3431_v1 = vpop.f32.mrf.mxu0 }
 0x185   : > { %v3412_v48 = vadd.f32 %v3411_v4, %v3392_v8  ;;  %v3451_v5 = vpop.f32.mrf.mxu1 }
 0x187   : > { %v3432_v41 = vadd.f32 %v3431_v1, %v3412_v48 }
 0x189   : > { %v3452_v13 = vadd.f32 %v3451_v5, %v3432_v41 }
 0x18a   : > { %v3471_v59 = vpop.f32.mrf.mxu2 }
 0x18b   : > { %v3472_v12 = vadd.f32 %v3471_v59, %v3452_v13  ;;  %v3491_v30 = vpop.f32.mrf.mxu3  ;;  %v1143_v59 = vld [vmem:[#allocation7] sm:$0x3] }
 0x18c   : > { %v3511_v29 = vpop.f32.mrf.mxu0 }
 0x18d   : > { %v3492_v53 = vadd.f32 %v3491_v30, %v3472_v12  ;;  %v3531_v58 = vpop.f32.mrf.mxu1 }
 0x18f   : > { %v3512_v63 = vadd.f32 %v3511_v29, %v3492_v53 }
 0x191   : > { %v3532_v14 = vadd.f32 %v3531_v58, %v3512_v63 }
 0x192   : > { %v3551_v51 = vpop.f32.mrf.mxu2 }
 0x193   : > { %v3552_v33 = vadd.f32 %v3551_v51, %v3532_v14  ;;  %v3571_v16 = vpop.f32.mrf.mxu3 }
 0x194   : > { %v3591_v42 = vpop.f32.mrf.mxu0 }
 0x195   : > { %v3572_v0 = vadd.f32 %v3571_v16, %v3552_v33  ;;  %v3611_v57 = vpop.f32.mrf.mxu1 }
 0x197   : > { %v3592_v49 = vadd.f32 %v3591_v42, %v3572_v0 }
 0x199   : > { %v3612_v60 = vadd.f32 %v3611_v57, %v3592_v49 }
 0x19a   : > { %v3631_v34 = vpop.f32.mrf.mxu2 }
 0x19b   : > { %v3632_v50 = vadd.f32 %v3631_v34, %v3612_v60  ;;  %v3651_v2 = vpop.f32.mrf.mxu3 }
 0x19c   : > { %v3671_v61 = vpop.f32.mrf.mxu0 }
 0x19d   : > { %v3652_v35 = vadd.f32 %v3651_v2, %v3632_v50  ;;  %v3691_v3 = vpop.f32.mrf.mxu1 }
 0x19f   : > { %v3672_v43 = vadd.f32 %v3671_v61, %v3652_v35 }
 0x1a1   : > { %v3692_v32 = vadd.f32 %v3691_v3, %v3672_v43 }
 0x1a2   : > { %v3711_v37 = vpop.f32.mrf.mxu2 }
 0x1a3   : > { %v3712_v44 = vadd.f32 %v3711_v37, %v3692_v32  ;;  %v3731_v45 = vpop.f32.mrf.mxu3 }
 0x1a4   : > { %v3751_v39 = vpop.f32.mrf.mxu0 }
 0x1a5   : > { %v3732_v52 = vadd.f32 %v3731_v45, %v3712_v44  ;;  %v3771_v31 = vpop.f32.mrf.mxu1 }
 0x1a7   : > { %v3752_v46 = vadd.f32 %v3751_v39, %v3732_v52 }
 0x1a9   : > { %v3772_v62 = vadd.f32 %v3771_v31, %v3752_v46 }
 0x1aa   : > { %v3791_v36 = vpop.f32.mrf.mxu2 }
 0x1ab   : > { %v3792_v10 = vadd.f32 %v3791_v36, %v3772_v62  ;;  %v3811_v18 = vpop.f32.mrf.mxu3 }
 0x1ac   : > { %v3831_v28 = vpop.f32.mrf.mxu0 }
 0x1ad   : > { %v3812_v47 = vadd.f32 %v3811_v18, %v3792_v10  ;;  %v3851_v17 = vpop.f32.mrf.mxu1 }
 0x1af   : > { %v3832_v11 = vadd.f32 %v3831_v28, %v3812_v47 }
 0x1b1   : > { %v3852_v20 = vadd.f32 %v3851_v17, %v3832_v11 }
 0x1b2   : > { %v3871_v24 = vpop.f32.mrf.mxu2 }
 0x1b3   : > { %v3872_v23 = vadd.f32 %v3871_v24, %v3852_v20  ;;  %v3891_v15 = vpop.f32.mrf.mxu3 }
 0x1b4   : > { %v3911_v21 = vpop.f32.mrf.mxu0 }
 0x1b5   : > { %v3892_v22 = vadd.f32 %v3891_v15, %v3872_v23  ;;  %v3931_v55 = vpop.f32.mrf.mxu1 }
 0x1b7   : > { %v3912_v25 = vadd.f32 %v3911_v21, %v3892_v22 }
 0x1b9   : > { %v3932_v26 = vadd.f32 %v3931_v55, %v3912_v25 }
 0x1ba   : > { %v3951_v19 = vpop.f32.mrf.mxu2 }
 0x1bb   : > { %v3952_v40 = vadd.f32 %v3951_v19, %v3932_v26  ;;  %v3971_v56 = vpop.f32.mrf.mxu3 }
 0x1bc   : > { %v3991_v7 = vpop.f32.mrf.mxu0 }
 0x1bd   : > { %v3972_v27 = vadd.f32 %v3971_v56, %v3952_v40  ;;  %v4011_v6 = vpop.f32.mrf.mxu1 }
 0x1bf   : > { %v3992_v9 = vadd.f32 %v3991_v7, %v3972_v27 }
 0x1c1   : > { %v4012_v38 = vadd.f32 %v4011_v6, %v3992_v9 }
 0x1c2   : > { %v4031_v54 = vpop.f32.mrf.mxu2 }
 0x1c3   : > { %v4032_v8 = vadd.f32 %v4031_v54, %v4012_v38  ;;  %v4051_v4 = vpop.f32.mrf.mxu3 }
 0x1c4   : > { %v4071_v1 = vpop.f32.mrf.mxu0 }
 0x1c5   : > { %v4052_v48 = vadd.f32 %v4051_v4, %v4032_v8  ;;  %v4091_v5 = vpop.f32.mrf.mxu1 }
 0x1c7   : > { %v4072_v41 = vadd.f32 %v4071_v1, %v4052_v48 }
 0x1c9   : > { %v4092_v13 = vadd.f32 %v4091_v5, %v4072_v41 }
 0x1ca   : > { %v4111_v12 = vpop.f32.mrf.mxu2 }
 0x1cb   : > { %v4112_v30 = vadd.f32 %v4111_v12, %v4092_v13 }
 0x1cd   : > { %v4114_v29 = vadd.f32 %v4112_v30, %v1143_v59 }
 0x1cf   : > { %4116 = vst.msk [vmem:[#allocation7] sm:$0x3] %vm4115_vm8, %v4114_v29 }
 0x1d0   : > { %4356 = dma.vmem_to_hbm [thread:$0]  (%p4370_p5), %s4124_s12, 32, %s4126_s19, [#allocation4]  }
 0x1d1   : > { %4523 = dma.done.wait (%p4370_p5), [#allocation4], 32  }
 0x1d2   : > { %4525 = vsyncadd (%p4370_p5), [#allocation4], 4294967264 }
 0x1d3 PF: > { %p15_p8 = scmp.ge.s32.totalorder %s4589_s17, 6   ;;  %s5673_s12 = smov %s4532_s13 }
 0x1d4   : > { %s5674_s13 = smov %s4536_s14  ;;  %s5675_s14 = smov %s4599_s20 }
 0x1d5   : > { %s5676_s15 = smov %s4589_s17  ;;  %17 = sbr.rel (!%p15_p8) target bundleno = 5 (0x5), region = 81 }
 0x1da   :  { %4139 = vsyncpa [#allocation3], 1 }
 0x1db   :  { %4141 = vsyncpa [#allocation3 + $0x1], 1 }
 0x1dc   :  { %4142 = vsyncpa [#allocation6], 1 }
 0x1dd   :  { %4143 = vsyncpa [#allocation4], 1 }
 0x1de   :  { %4145 = vsyncpa [#allocation4 + $0x1], 1 }

</bundles_post_ra>
